<compile_context>
chip_gen: v7x
topology: tpu7x:2x2x1
jax: 0.10.0
libtpu: 0.0.40
codegen_flags: <defaults>
</compile_context>

<pallas_src>
import numpy as np
import jax
import jax.numpy as jnp
from jax.experimental import pallas as pl
from jax.experimental.pallas import tpu as pltpu

_LANE_CH = 128      # vector channels packed per row (lane group of 128)
_TILE_ROWS = 1024   # rows per grid step (~1.5 MiB per f32 x block at D=3)


def _round_up(a: int, b: int) -> int:
    return (a + b - 1) // b * b


def _vdropout_kernel(x_ref, m_ref, o_ref):
    # x_ref: (tm, 128*D) channel-interleaved vector components
    # m_ref: (tm, 128)   per-channel scale, values in {0, 1/keep_prob}
    d = x_ref.shape[1] // m_ref.shape[1]
    scale = jnp.repeat(m_ref[...], d, axis=-1)      # lane-expand (tm,128)->(tm,128*D)
    o_ref[...] = x_ref[...] * scale                 # single fused multiply


def vdropout(x, drop_rate: float, key, training: bool = True):
    """JAX/Pallas equivalent of protfill _VDropout.forward."""
    if not training or drop_rate == 0.0:
        return x

    keep = 1.0 - drop_rate
    orig_shape = x.shape
    D = int(orig_shape[-1])
    R = int(np.prod(orig_shape[:-1]))          # number of vector channels

    # Per-channel keep mask, pre-scaled by 1/keep (fold the scale into the mask).
    bern = jax.random.bernoulli(key, p=keep, shape=(R,))
    mask = jnp.where(bern, 1.0 / keep, 0.0).astype(x.dtype)

    # Lane-dense, transpose-free layout.
    row_w = _LANE_CH * D
    rows = (R + _LANE_CH - 1) // _LANE_CH
    tile_rows = min(_TILE_ROWS, _round_up(rows, 8))
    rows_padded = _round_up(rows, tile_rows)
    r_pad = rows_padded * _LANE_CH

    x_flat = x.reshape(-1)
    if r_pad != R:
        x_flat = jnp.pad(x_flat, (0, (r_pad - R) * D))
        mask = jnp.pad(mask, (0, r_pad - R))
    x2 = x_flat.reshape(rows_padded, row_w)
    m2 = mask.reshape(rows_padded, _LANE_CH)

    grid = (rows_padded // tile_rows,)
    out2 = pl.pallas_call(
        _vdropout_kernel,
        out_shape=jax.ShapeDtypeStruct((rows_padded, row_w), x.dtype),
        grid=grid,
        in_specs=[
            pl.BlockSpec((tile_rows, row_w), lambda i: (i, 0)),      # x rows
            pl.BlockSpec((tile_rows, _LANE_CH), lambda i: (i, 0)),   # mask rows
        ],
        out_specs=pl.BlockSpec((tile_rows, row_w), lambda i: (i, 0)),
        compiler_params=pltpu.CompilerParams(
            dimension_semantics=("parallel",)),
    )(x2, m2)

    out_flat = out2.reshape(-1)
    if r_pad != R:
        out_flat = out_flat[: R * D]
    return out_flat.reshape(orig_shape)


def _check(x, y, keep):
    xn = np.asarray(x)
    yn = np.asarray(y)
    per_channel_zero = np.all(yn == 0.0, axis=-1)
    per_channel_scaled = np.all(np.isclose(yn, xn / keep, atol=1e-5), axis=-1)
    assert np.all(per_channel_zero | per_channel_scaled), \
        "mask not applied per vector channel"


if __name__ == "__main__":
    root = jax.random.PRNGKey(0)
    kx1, kx2, km1, km2 = jax.random.split(root, 4)

    drop_rate = 0.25
    keep = 1.0 - drop_rate

    # GVP-style vector feature tensor: (batch=2, nodes=8, vec_channels=16, 3)
    x1 = jax.random.normal(kx1, (2, 8, 16, 3), dtype=jnp.float32)
    y1 = jax.block_until_ready(vdropout(x1, drop_rate, km1, training=True))
    _check(x1, y1, keep)

    # Odd channel count (exercises the pad-to-128 path).
    x2 = jax.random.normal(kx2, (5, 7, 3), dtype=jnp.float32)
    y2 = jax.block_until_ready(vdropout(x2, drop_rate, km2, training=True))
    _check(x2, y2, keep)

    # Eval mode: identity.
    y_eval = jax.block_until_ready(vdropout(x1, drop_rate, km1, training=False))
    assert np.allclose(np.asarray(y_eval), np.asarray(x1))

    print("KERNEL_OK")
</pallas_src>

<mosaic_0001>
module attributes {stable_mosaic.version = 11 : i64} {
  func.func @_vdropout_kernel(%arg0: i32, %arg1: memref<8x384xf32, #tpu.memory_space<vmem>>, %arg2: memref<8x128xf32, #tpu.memory_space<vmem>>, %arg3: memref<8x384xf32, #tpu.memory_space<vmem>>) attributes {dimension_semantics = [#tpu.dimension_semantics<parallel>], iteration_bounds = array<i64: 1>, scalar_prefetch = 0 : i64, scratch_operands = 0 : i64, tpu.core_type = #tpu.core_type<tc>, window_params = [{transform_indices = @transform_0, window_bounds = array<i64: 8, 384>}, {transform_indices = @transform_1, window_bounds = array<i64: 8, 128>}, {transform_indices = @transform_2, window_bounds = array<i64: 8, 384>}]} {
    %c0 = arith.constant 0 : index
    %c0_0 = arith.constant 0 : index
    %0 = vector.load %arg2[%c0, %c0_0] : memref<8x128xf32, #tpu.memory_space<vmem>>, vector<8x128xf32>
    %1 = vector.shape_cast %0 : vector<8x128xf32> to vector<8x128x1xf32>
    %2 = vector.broadcast %1 : vector<8x128x1xf32> to vector<8x128x3xf32>
    %3 = vector.shape_cast %2 : vector<8x128x3xf32> to vector<8x384xf32>
    %c0_1 = arith.constant 0 : index
    %c0_2 = arith.constant 0 : index
    %4 = vector.load %arg1[%c0_1, %c0_2] : memref<8x384xf32, #tpu.memory_space<vmem>>, vector<8x384xf32>
    %5 = arith.mulf %4, %3 : vector<8x384xf32>
    %c0_3 = arith.constant 0 : index
    %c0_4 = arith.constant 0 : index
    %6 = vector.load %arg3[%c0_3, %c0_4] : memref<8x384xf32, #tpu.memory_space<vmem>>, vector<8x384xf32>
    tpu.vector_store %arg3[%c0_3, %c0_4], %5 {strides = array<i32>} : memref<8x384xf32, #tpu.memory_space<vmem>>, vector<8x384xf32>,
    return
  }
  func.func @transform_0(%arg0: i32) -> (i32, i32) {
    %c0_i32 = arith.constant 0 : i32
    %c0_i32_0 = arith.constant 0 : i32
    return %arg0, %c0_i32 : i32, i32
  }
  func.func @transform_1(%arg0: i32) -> (i32, i32) {
    %c0_i32 = arith.constant 0 : i32
    %c0_i32_0 = arith.constant 0 : i32
    return %arg0, %c0_i32 : i32, i32
  }
  func.func @transform_2(%arg0: i32) -> (i32, i32) {
    %c0_i32 = arith.constant 0 : i32
    %c0_i32_0 = arith.constant 0 : i32
    return %arg0, %c0_i32 : i32, i32
  }
}

</mosaic_0001>

<bundles_post_ra>
// kernel: tpu_custom_call.1
= control target key start
LH: loop header
LB: loop body
LE: loop exit
PB: predicated region body
PF: predicated region fallthrough
CT: control target
= control target key end

     0   :  { %7 = vsyncpa [#allocation3], 0  ;;  %s4915_s0 = inlined_call_operand.hbm [shape: f32[8,384], index: 0, kind: input, shape index: {}]   ;;  %s4916_s1 = inlined_call_operand.hbm [shape: f32[8,128], index: 1, kind: input, shape index: {}]   ;;  %s4917_s2 = inlined_call_operand.hbm [shape: f32[8,384], index: 2, kind: output, shape index: {}]  }
   0x1   :  { %8 = vsyncpa [#allocation6], 0 }
   0x2   :  { %9 = vsyncpa [#allocation4], 0  ;;  %s3740_s9 = smov [#allocation2]   ;;  %s3741_s11 = smov [#allocation5]  }
   0x3   :  { %s16_s10 = sshll.u32 %s3740_s9, 4  ;;  %s26_s12 = sshll.u32 %s3741_s11, 4  ;;  %s17_s10 = int_to_ptr.vmem [resolvable:$true] %s16_s10  ;;  %s27_s12 = int_to_ptr.vmem [resolvable:$true] %s26_s12 }
   0x4   :  { %s3668_s15 = scalar_lea.hbm %s4915_s0, 384 }
   0x5   :  { %p3669_p0 = scmp.ne.s32.totalorder %s4915_s0, %s3668_s15  ;;  %p3672_p1 = scmp.lt.u32.totalorder %s3668_s15, %s4915_s0 }
   0x7   :  { %p3674_p2 = pnand %p3672_p1, %p3669_p0 }
   0x9   :  { %3677 = shalt.err (!%p3674_p2)
}
   0xa   :  { %s3678_s20 = scalar_lea.vmem %s17_s10, 384  ;;  %p3683_p4 = scmp.lt.s32.totalorder %s17_s10, %s17_s10 }
   0xb   :  { %p3679_p3 = scmp.ne.s32.totalorder %s17_s10, %s3678_s20  ;;  %p3684_p5 = scmp.lt.s32.totalorder %s3678_s20, %s3678_s20 }
   0xd   :  { %p3685_p6 = por %p3684_p5, %p3683_p4 }
   0xf   :  { %p3686_p7 = pnand %p3685_p6, %p3679_p3 }
  0x11   :  { %3689 = shalt.err (!%p3686_p7)
}
  0x12   :  { %19 = dma.hbm_to_vmem [thread:$0]  %s4915_s0, 384, %s17_s10, [#allocation3]  }
  0x13   :  { %s3690_s25 = scalar_lea.hbm %s4916_s1, 128 }
  0x14   :  { %p3691_p8 = scmp.ne.s32.totalorder %s4916_s1, %s3690_s25  ;;  %p3694_p9 = scmp.lt.u32.totalorder %s3690_s25, %s4916_s1 }
  0x16   :  { %p3696_p10 = pnand %p3694_p9, %p3691_p8 }
  0x18   :  { %3699 = shalt.err (!%p3696_p10)
}
  0x19   :  { %s3700_s30 = scalar_lea.vmem %s27_s12, 128  ;;  %p3705_p12 = scmp.lt.s32.totalorder %s27_s12, %s27_s12 }
  0x1a   :  { %p3701_p11 = scmp.ne.s32.totalorder %s27_s12, %s3700_s30  ;;  %p3706_p13 = scmp.lt.s32.totalorder %s3700_s30, %s3700_s30 }
  0x1c   :  { %p3707_p0 = por %p3706_p13, %p3705_p12 }
  0x1e   :  { %p3708_p1 = pnand %p3707_p0, %p3701_p11 }
  0x20   :  { %3711 = shalt.err (!%p3708_p1)
}
  0x21   :  { %29 = dma.hbm_to_vmem [thread:$0]  %s4916_s1, 128, %s27_s12, [#allocation6]  }
  0x22   :  { %3734 = dma.done.wait [#allocation3], 384  }
  0x23   :  { %3735 = vsyncadd [#allocation3], 4294966912 }
  0x24   :  { %3736 = dma.done.wait [#allocation6], 128  }
  0x25   :  { %3737 = vsyncadd [#allocation6], 4294967168  ;;  %v37_v0 = vlaneseq  ;;  %v3914_v3 = vld [vmem:[#allocation5] sm:$0xff]  ;;  %s3744_s1 = smov 6   ;;  %s3745_s4 = smov 3   ;;  %vm3257_vm0 = vcmask 23552  }
  0x26   :  { %s3746_s5 = smov 12   ;;  %s3747_s6 = smov 9   ;;  %vm3259_vm1 = vcmask 48128   ;;  %vm3261_vm2 = vcmask 72704   ;;  %vm3263_vm3 = vcmask 97280   ;;  %vm3265_vm4 = vcmask 121856  }
  0x27   :  { %v3911_v1 = vshrl.u32 %v37_v0, 7  ;;  %s3748_s7 = smov 18   ;;  %s3749_s8 = smov 15   ;;  %vm3267_vm5 = vcmask 146432   ;;  %vm3269_vm6 = vcmask 171008   ;;  %vm3271_vm7 = vcmask 195584  }
  0x28   :  { %s3750_s9 = smov 21   ;;  %s3751_s10 = smov 24   ;;  %vm3273_vm8 = vcmask 220160   ;;  %vm3275_vm9 = vcmask 244736   ;;  %vm3277_vm10 = vcmask 269312   ;;  %vm3279_vm11 = vcmask 293888  }
  0x29   :  { %v39_v2 = vsub.s32 0, %v3911_v1  ;;  %v106_v5 = vsub.s32 1, %v3911_v1  ;;  %v173_v7 = vsub.s32 2, %v3911_v1  ;;  %v240_v9 = vsub.s32 3, %v3911_v1  ;;  %s3752_s11 = smov 27   ;;  %s3753_s12 = smov 30  }
  0x2a   :  { %v307_v15 = vsub.s32 4, %v3911_v1  ;;  %v374_v33 = vsub.s32 5, %v3911_v1  ;;  %v441_v51 = vsub.s32 6, %v3911_v1  ;;  %s3754_s13 = smov 33   ;;  %s3755_s14 = smov 36   ;;  %vm3281_vm12 = vcmask 318464  }
  0x2b   :  { %v40_v4 = vrot.slane %v3914_v3, %v39_v2  ;;  %v107_v6 = vrot.slane %v3914_v3, %v106_v5  ;;  %v174_v8 = vrot.slane %v3914_v3, %v173_v7  ;;  %v241_v10 = vrot.slane %v3914_v3, %v240_v9  ;;  %s3756_s15 = smov 39   ;;  %s3757_s16 = smov 42  }
  0x2c   :  { %v308_v18 = vrot.slane %v3914_v3, %v307_v15  ;;  %v375_v36 = vrot.slane %v3914_v3, %v374_v33  ;;  %v442_v54 = vrot.slane %v3914_v3, %v441_v51  ;;  %v508_v7 = vsub.s32 7, %v3911_v1  ;;  %s3758_s17 = smov 45   ;;  %s3759_s18 = smov 48  }
  0x2d   :  { %50 = vbcast.lane.b32.xlu1 %v40_v4, 272  ;;  %42 = vbcast.lane.b32.xlu0 %v40_v4, 256  ;;  %v3742_v15 = vmov 1983009808   ;;  %s3760_s19 = smov 51   ;;  %s3761_s20 = smov 54  }
  0x2e   :  { %s3762_s21 = smov 57   ;;  %s3763_s22 = smov 60   ;;  %vm3283_vm13 = vcmask 343040   ;;  %vm3285_vm14 = vcmask 367616   ;;  %vm3287_vm15 = vcmask 392192  }
  0x2f   :  { %s3764_s23 = smov 63   ;;  %s3765_s24 = smov 66  }
  0x30   :  { %s3766_s25 = smov 69   ;;  %s3767_s26 = smov 72  }
  0x31   :  { %54 = vbcast.lane.b32.xlu1 %v40_v4, 280  ;;  %46 = vbcast.lane.b32.xlu0 %v40_v4, 264  ;;  %s3768_s27 = smov 75   ;;  %s3769_s28 = smov 78  }
  0x32   :  { %s3770_s29 = smov 81   ;;  %s3771_s30 = smov 84  }
  0x33   :  { %s3772_s0 = smov 87   ;;  %s3773_s3 = smov 90  }
  0x35   :  { %62 = vbcast.lane.b32.xlu1 %v40_v4, 296  ;;  %58 = vbcast.lane.b32.xlu0 %v40_v4, 288 }
  0x39   :  { %70 = vbcast.lane.b32.xlu1 %v40_v4, 312  ;;  %66 = vbcast.lane.b32.xlu0 %v40_v4, 304 }
  0x3d   :  { %78 = vbcast.lane.b32.xlu1 %v40_v4, 328  ;;  %74 = vbcast.lane.b32.xlu0 %v40_v4, 320 }
  0x41   :  { %86 = vbcast.lane.b32.xlu1 %v40_v4, 344  ;;  %82 = vbcast.lane.b32.xlu0 %v40_v4, 336 }
  0x45   :  { %94 = vbcast.lane.b32.xlu1 %v40_v4, 360  ;;  %90 = vbcast.lane.b32.xlu0 %v40_v4, 352 }
  0x49   :  { %102 = vbcast.lane.b32.xlu1 %v40_v4, 376  ;;  %98 = vbcast.lane.b32.xlu0 %v40_v4, 368 }
  0x4d   :  { %113 = vbcast.lane.b32.xlu1 %v107_v6, 264  ;;  %109 = vbcast.lane.b32.xlu0 %v107_v6, 256 }
  0x51   :  { %121 = vbcast.lane.b32.xlu1 %v107_v6, 280  ;;  %117 = vbcast.lane.b32.xlu0 %v107_v6, 272 }
  0x55   :  { %129 = vbcast.lane.b32.xlu1 %v107_v6, 296  ;;  %125 = vbcast.lane.b32.xlu0 %v107_v6, 288 }
  0x59   :  { %137 = vbcast.lane.b32.xlu1 %v107_v6, 312  ;;  %133 = vbcast.lane.b32.xlu0 %v107_v6, 304 }
  0x5d   :  { %145 = vbcast.lane.b32.xlu1 %v107_v6, 328  ;;  %141 = vbcast.lane.b32.xlu0 %v107_v6, 320 }
  0x61   :  { %153 = vbcast.lane.b32.xlu1 %v107_v6, 344  ;;  %149 = vbcast.lane.b32.xlu0 %v107_v6, 336 }
  0x65   :  { %161 = vbcast.lane.b32.xlu1 %v107_v6, 360  ;;  %157 = vbcast.lane.b32.xlu0 %v107_v6, 352 }
  0x69   :  { %169 = vbcast.lane.b32.xlu1 %v107_v6, 376  ;;  %165 = vbcast.lane.b32.xlu0 %v107_v6, 368 }
  0x6d   :  { %180 = vbcast.lane.b32.xlu1 %v174_v8, 264  ;;  %176 = vbcast.lane.b32.xlu0 %v174_v8, 256 }
  0x71   :  { %188 = vbcast.lane.b32.xlu1 %v174_v8, 280  ;;  %184 = vbcast.lane.b32.xlu0 %v174_v8, 272 }
  0x75   :  { %196 = vbcast.lane.b32.xlu1 %v174_v8, 296  ;;  %192 = vbcast.lane.b32.xlu0 %v174_v8, 288 }
  0x79   :  { %204 = vbcast.lane.b32.xlu1 %v174_v8, 312  ;;  %200 = vbcast.lane.b32.xlu0 %v174_v8, 304 }
  0x7d   :  { %212 = vbcast.lane.b32.xlu1 %v174_v8, 328  ;;  %208 = vbcast.lane.b32.xlu0 %v174_v8, 320 }
  0x81   :  { %220 = vbcast.lane.b32.xlu1 %v174_v8, 344  ;;  %216 = vbcast.lane.b32.xlu0 %v174_v8, 336 }
  0x85   :  { %228 = vbcast.lane.b32.xlu1 %v174_v8, 360  ;;  %224 = vbcast.lane.b32.xlu0 %v174_v8, 352 }
  0x89   :  { %236 = vbcast.lane.b32.xlu1 %v174_v8, 376  ;;  %232 = vbcast.lane.b32.xlu0 %v174_v8, 368 }
  0x8d   :  { %247 = vbcast.lane.b32.xlu1 %v241_v10, 264  ;;  %243 = vbcast.lane.b32.xlu0 %v241_v10, 256 }
  0x91   :  { %255 = vbcast.lane.b32.xlu1 %v241_v10, 280  ;;  %251 = vbcast.lane.b32.xlu0 %v241_v10, 272 }
  0x95   :  { %263 = vbcast.lane.b32.xlu1 %v241_v10, 296  ;;  %259 = vbcast.lane.b32.xlu0 %v241_v10, 288 }
  0x99   :  { %271 = vbcast.lane.b32.xlu1 %v241_v10, 312  ;;  %267 = vbcast.lane.b32.xlu0 %v241_v10, 304 }
  0x9d   :  { %279 = vbcast.lane.b32.xlu1 %v241_v10, 328  ;;  %275 = vbcast.lane.b32.xlu0 %v241_v10, 320 }
  0x9f   :  { %v3923_v11 = vpop.permute.xlu1 %50  ;;  %v3925_v12 = vpop.permute.xlu0 %42 }
  0xa1   :  { %287 = vbcast.lane.b32.xlu1 %v241_v10, 344  ;;  %283 = vbcast.lane.b32.xlu0 %v241_v10, 336 }
  0xa3   :  { %v3927_v13 = vpop.permute.xlu1 %54  ;;  %v3929_v14 = vpop.permute.xlu0 %46 }
  0xa5   :  { %295 = vbcast.lane.b32.xlu1 %v241_v10, 360  ;;  %291 = vbcast.lane.b32.xlu0 %v241_v10, 352 }
  0xa7   :  { %v3932_v16 = vpop.permute.xlu1 %62  ;;  %v3934_v17 = vpop.permute.xlu0 %58 }
  0xa9   :  { %303 = vbcast.lane.b32.xlu1 %v241_v10, 376  ;;  %299 = vbcast.lane.b32.xlu0 %v241_v10, 368  ;;  %v509_v10 = vrot.slane %v3914_v3, %v508_v7 }
  0xab   :  { %v3937_v19 = vpop.permute.xlu1 %70  ;;  %v3939_v20 = vpop.permute.xlu0 %66 }
  0xac   :  { %4994 = vst [vmem:[#allocation11_spill] sm:$0xff] %v3937_v19  ;;  %4995 = vst [vmem:[#allocation12_spill] sm:$0xff] %v3939_v20 }
  0xad   :  { %314 = vbcast.lane.b32.xlu1 %v308_v18, 264  ;;  %310 = vbcast.lane.b32.xlu0 %v308_v18, 256 }
  0xaf   :  { %v3941_v21 = vpop.permute.xlu1 %78  ;;  %v3943_v22 = vpop.permute.xlu0 %74 }
  0xb0   :  { %4996 = vst [vmem:[#allocation13_spill] sm:$0xff] %v3941_v21  ;;  %4997 = vst [vmem:[#allocation14_spill] sm:$0xff] %v3943_v22 }
  0xb1   :  { %322 = vbcast.lane.b32.xlu1 %v308_v18, 280  ;;  %318 = vbcast.lane.b32.xlu0 %v308_v18, 272 }
  0xb3   :  { %v3945_v23 = vpop.permute.xlu1 %86  ;;  %v3947_v24 = vpop.permute.xlu0 %82 }
  0xb4   :  { %4998 = vst [vmem:[#allocation15_spill] sm:$0xff] %v3945_v23  ;;  %4999 = vst [vmem:[#allocation16_spill] sm:$0xff] %v3947_v24 }
  0xb5   :  { %330 = vbcast.lane.b32.xlu1 %v308_v18, 296  ;;  %326 = vbcast.lane.b32.xlu0 %v308_v18, 288 }
  0xb7   :  { %v3949_v25 = vpop.permute.xlu1 %94  ;;  %v3951_v26 = vpop.permute.xlu0 %90 }
  0xb8   :  { %5000 = vst [vmem:[#allocation17_spill] sm:$0xff] %v3949_v25  ;;  %5001 = vst [vmem:[#allocation18_spill] sm:$0xff] %v3951_v26 }
  0xb9   :  { %338 = vbcast.lane.b32.xlu1 %v308_v18, 312  ;;  %334 = vbcast.lane.b32.xlu0 %v308_v18, 304 }
  0xbb   :  { %v3953_v27 = vpop.permute.xlu1 %102  ;;  %v3955_v28 = vpop.permute.xlu0 %98 }
  0xbc   :  { %5002 = vst [vmem:[#allocation19_spill] sm:$0xff] %v3953_v27  ;;  %5003 = vst [vmem:[#allocation20_spill] sm:$0xff] %v3955_v28 }
  0xbd   :  { %346 = vbcast.lane.b32.xlu1 %v308_v18, 328  ;;  %342 = vbcast.lane.b32.xlu0 %v308_v18, 320 }
  0xbf   :  { %v3957_v29 = vpop.permute.xlu1 %113  ;;  %v3959_v30 = vpop.permute.xlu0 %109 }
  0xc1   :  { %354 = vbcast.lane.b32.xlu1 %v308_v18, 344  ;;  %350 = vbcast.lane.b32.xlu0 %v308_v18, 336 }
  0xc3   :  { %v3961_v31 = vpop.permute.xlu1 %121  ;;  %v3963_v32 = vpop.permute.xlu0 %117 }
  0xc5   :  { %362 = vbcast.lane.b32.xlu1 %v308_v18, 360  ;;  %358 = vbcast.lane.b32.xlu0 %v308_v18, 352 }
  0xc7   :  { %v3966_v34 = vpop.permute.xlu1 %129  ;;  %v3968_v35 = vpop.permute.xlu0 %125 }
  0xc8   :  { %5004 = vst [vmem:[#allocation21_spill] sm:$0xff] %v3966_v34 }
  0xc9   :  { %370 = vbcast.lane.b32.xlu1 %v308_v18, 376  ;;  %366 = vbcast.lane.b32.xlu0 %v308_v18, 368  ;;  %v576_v18 = vunpack.c.l.s4 %v3742_v15 }
  0xcb   :  { %v3971_v37 = vpop.permute.xlu1 %137  ;;  %v3973_v38 = vpop.permute.xlu0 %133  ;;  %v577_v51 = vunpack.c.0.s8 %v576_v18 }
  0xcc   :  { %5005 = vst [vmem:[#allocation22_spill] sm:$0xff] %v3971_v37  ;;  %5006 = vst [vmem:[#allocation23_spill] sm:$0xff] %v3973_v38 }
  0xcd   :  { %381 = vbcast.lane.b32.xlu1 %v375_v36, 264  ;;  %377 = vbcast.lane.b32.xlu0 %v375_v36, 256 }
  0xcf   :  { %v3975_v39 = vpop.permute.xlu1 %145  ;;  %v3977_v40 = vpop.permute.xlu0 %141 }
  0xd0   :  { %5007 = vst [vmem:[#allocation24_spill] sm:$0xff] %v3975_v39  ;;  %5008 = vst [vmem:[#allocation25_spill] sm:$0xff] %v3977_v40 }
  0xd1   :  { %389 = vbcast.lane.b32.xlu1 %v375_v36, 280  ;;  %385 = vbcast.lane.b32.xlu0 %v375_v36, 272 }
  0xd3   :  { %v3979_v41 = vpop.permute.xlu1 %153  ;;  %v3981_v42 = vpop.permute.xlu0 %149 }
  0xd4   :  { %5009 = vst [vmem:[#allocation26_spill] sm:$0xff] %v3979_v41 }
  0xd5   :  { %397 = vbcast.lane.b32.xlu1 %v375_v36, 296  ;;  %393 = vbcast.lane.b32.xlu0 %v375_v36, 288 }
  0xd7   :  { %v3983_v43 = vpop.permute.xlu1 %161  ;;  %v3985_v44 = vpop.permute.xlu0 %157 }
  0xd8   :  { %5010 = vst [vmem:[#allocation27_spill] sm:$0xff] %v3983_v43  ;;  %5011 = vst [vmem:[#allocation28_spill] sm:$0xff] %v3985_v44 }
  0xd9   :  { %405 = vbcast.lane.b32.xlu1 %v375_v36, 312  ;;  %401 = vbcast.lane.b32.xlu0 %v375_v36, 304 }
  0xdb   :  { %v3987_v45 = vpop.permute.xlu1 %169  ;;  %v3989_v46 = vpop.permute.xlu0 %165 }
  0xdc   :  { %5012 = vst [vmem:[#allocation29_spill] sm:$0xff] %v3987_v45  ;;  %5013 = vst [vmem:[#allocation30_spill] sm:$0xff] %v3989_v46 }
  0xdd   :  { %413 = vbcast.lane.b32.xlu1 %v375_v36, 328  ;;  %409 = vbcast.lane.b32.xlu0 %v375_v36, 320 }
  0xdf   :  { %v3991_v47 = vpop.permute.xlu1 %180  ;;  %v3993_v48 = vpop.permute.xlu0 %176 }
  0xe0   :  { %v574_v24 = vcombine.high %v3925_v12, %v3993_v48 }
  0xe1   :  { %421 = vbcast.lane.b32.xlu1 %v375_v36, 344  ;;  %417 = vbcast.lane.b32.xlu0 %v375_v36, 336 }
  0xe3   :  { %v3995_v49 = vpop.permute.xlu1 %188  ;;  %v3997_v50 = vpop.permute.xlu0 %184 }
  0xe5   :  { %429 = vbcast.lane.b32.xlu1 %v375_v36, 360  ;;  %425 = vbcast.lane.b32.xlu0 %v375_v36, 352 }
  0xe7   :  { %v4000_v52 = vpop.permute.xlu1 %196  ;;  %v4002_v53 = vpop.permute.xlu0 %192 }
  0xe9   :  { %437 = vbcast.lane.b32.xlu1 %v375_v36, 376  ;;  %433 = vbcast.lane.b32.xlu0 %v375_v36, 368 }
  0xeb   :  { %v4005_v55 = vpop.permute.xlu1 %204  ;;  %v4007_v56 = vpop.permute.xlu0 %200 }
  0xec   :  { %5014 = vst [vmem:[#allocation31_spill] sm:$0xff] %v4005_v55  ;;  %5015 = vst [vmem:[#allocation32_spill] sm:$0xff] %v4007_v56 }
  0xed   :  { %448 = vbcast.lane.b32.xlu1 %v442_v54, 264  ;;  %444 = vbcast.lane.b32.xlu0 %v442_v54, 256 }
  0xef   :  { %v4009_v57 = vpop.permute.xlu1 %212  ;;  %v4011_v58 = vpop.permute.xlu0 %208 }
  0xf0   :  { %5016 = vst [vmem:[#allocation33_spill] sm:$0xff] %v4009_v57  ;;  %5017 = vst [vmem:[#allocation34_spill] sm:$0xff] %v4011_v58  ;;  %v1798_v45 = vcombine.high %v3941_v21, %v4009_v57 }
  0xf1   :  { %456 = vbcast.lane.b32.xlu1 %v442_v54, 280  ;;  %452 = vbcast.lane.b32.xlu0 %v442_v54, 272 }
  0xf3   :  { %v4013_v59 = vpop.permute.xlu1 %220  ;;  %v4015_v60 = vpop.permute.xlu0 %216 }
  0xf4   :  { %5018 = vst [vmem:[#allocation35_spill] sm:$0xff] %v4013_v59  ;;  %5019 = vst [vmem:[#allocation36_spill] sm:$0xff] %v4015_v60 }
  0xf5   :  { %464 = vbcast.lane.b32.xlu1 %v442_v54, 296  ;;  %460 = vbcast.lane.b32.xlu0 %v442_v54, 288 }
  0xf7   :  { %v4017_v61 = vpop.permute.xlu1 %228  ;;  %v4019_v62 = vpop.permute.xlu0 %224 }
  0xf8   :  { %5020 = vst [vmem:[#allocation37_spill] sm:$0xff] %v4017_v61  ;;  %5021 = vst [vmem:[#allocation38_spill] sm:$0xff] %v4019_v62 }
  0xf9   :  { %472 = vbcast.lane.b32.xlu1 %v442_v54, 312  ;;  %468 = vbcast.lane.b32.xlu0 %v442_v54, 304 }
  0xfb   :  { %v4021_v63 = vpop.permute.xlu1 %236  ;;  %v4023_v0 = vpop.permute.xlu0 %232 }
  0xfc   :  { %5022 = vst [vmem:[#allocation39_spill] sm:$0xff] %v4021_v63  ;;  %5023 = vst [vmem:[#allocation40_spill] sm:$0xff] %v4023_v0 }
  0xfd   :  { %480 = vbcast.lane.b32.xlu1 %v442_v54, 328  ;;  %476 = vbcast.lane.b32.xlu0 %v442_v54, 320 }
  0xff   :  { %v4025_v2 = vpop.permute.xlu1 %247  ;;  %v4027_v4 = vpop.permute.xlu0 %243 }
 0x101   :  { %488 = vbcast.lane.b32.xlu1 %v442_v54, 344  ;;  %484 = vbcast.lane.b32.xlu0 %v442_v54, 336 }
 0x103   :  { %v4029_v5 = vpop.permute.xlu1 %255  ;;  %v4031_v6 = vpop.permute.xlu0 %251 }
 0x105   :  { %496 = vbcast.lane.b32.xlu1 %v442_v54, 360  ;;  %492 = vbcast.lane.b32.xlu0 %v442_v54, 352 }
 0x107   :  { %v4034_v8 = vpop.permute.xlu1 %263  ;;  %v4036_v9 = vpop.permute.xlu0 %259 }
 0x108   :  { %5024 = vst [vmem:[#allocation41_spill] sm:$0xff] %v4034_v8 }
 0x109   :  { %504 = vbcast.lane.b32.xlu1 %v442_v54, 376  ;;  %500 = vbcast.lane.b32.xlu0 %v442_v54, 368  ;;  %v4052_v54 = vsub.s32 %v577_v51, %v3911_v1 }
 0x10b   :  { %v4039_v33 = vpop.permute.xlu1 %271  ;;  %v4041_v36 = vpop.permute.xlu0 %267  ;;  %v4059_v18 = vrot.slane %v1798_v45, %v4052_v54 }
 0x10c   :  { %5025 = vst [vmem:[#allocation42_spill] sm:$0xff] %v4039_v33  ;;  %5026 = vst [vmem:[#allocation43_spill] sm:$0xff] %v4041_v36 }
 0x10d   :  { %515 = vbcast.lane.b32.xlu1 %v509_v10, 264  ;;  %511 = vbcast.lane.b32.xlu0 %v509_v10, 256  ;;  %5030 = vst [vmem:[#allocation47_spill] sm:$0xff] %v4059_v18  ;;  %v573_v18 = vcombine.low %v3925_v12, %v3993_v48 }
 0x10f   :  { %v4043_v27 = vpop.permute.xlu1 %279  ;;  %v4045_v63 = vpop.permute.xlu0 %275  ;;  %v581_v60 = vrot.slane %v573_v18, %v4052_v54 }
 0x110   :  { %5027 = vst [vmem:[#allocation44_spill] sm:$0xff] %v4043_v27  ;;  %5028 = vst [vmem:[#allocation45_spill] sm:$0xff] %v4045_v63  ;;  %v1814_v3 = vcombine.high %v3975_v39, %v4043_v27 }
 0x111   :  { %523 = vbcast.lane.b32.xlu1 %v509_v10, 280  ;;  %519 = vbcast.lane.b32.xlu0 %v509_v10, 272 }
 0x112   :  { %v4062_v28 = vrot.slane %v1814_v3, %v4052_v54 }
 0x113   :  { %v4054_v7 = vpop.permute.xlu1 %287  ;;  %v4056_v15 = vpop.permute.xlu0 %283 }
 0x114   :  { %5029 = vst [vmem:[#allocation46_spill] sm:$0xff] %v4054_v7  ;;  %5031 = vst [vmem:[#allocation48_spill] sm:$0xff] %v4062_v28 }
 0x115   :  { %531 = vbcast.lane.b32.xlu1 %v509_v10, 296  ;;  %527 = vbcast.lane.b32.xlu0 %v509_v10, 288 }
 0x117   :  { %v4066_v46 = vpop.permute.xlu1 %295  ;;  %v4068_v51 = vpop.permute.xlu0 %291 }
 0x118   :  { %5032 = vst [vmem:[#allocation49_spill] sm:$0xff] %v4066_v46  ;;  %5033 = vst [vmem:[#allocation50_spill] sm:$0xff] %v4068_v51 }
 0x119   :  { %539 = vbcast.lane.b32.xlu1 %v509_v10, 312  ;;  %535 = vbcast.lane.b32.xlu0 %v509_v10, 304 }
 0x11b   :  { %v4070_v25 = vpop.permute.xlu1 %303  ;;  %v4072_v61 = vpop.permute.xlu0 %299 }
 0x11c   :  { %5034 = vst [vmem:[#allocation51_spill] sm:$0xff] %v4070_v25  ;;  %5035 = vst [vmem:[#allocation52_spill] sm:$0xff] %v4072_v61 }
 0x11d   :  { %547 = vbcast.lane.b32.xlu1 %v509_v10, 328  ;;  %543 = vbcast.lane.b32.xlu0 %v509_v10, 320 }
 0x11f   :  { %v4074_v45 = vpop.permute.xlu1 %314  ;;  %v4076_v3 = vpop.permute.xlu0 %310 }
 0x121   :  { %555 = vbcast.lane.b32.xlu1 %v509_v10, 344  ;;  %551 = vbcast.lane.b32.xlu0 %v509_v10, 336 }
 0x123   :  { %v4078_v0 = vpop.permute.xlu1 %322  ;;  %v4080_v43 = vpop.permute.xlu0 %318 }
 0x125   :  { %563 = vbcast.lane.b32.xlu1 %v509_v10, 360  ;;  %559 = vbcast.lane.b32.xlu0 %v509_v10, 352 }
 0x127   :  { %v4082_v46 = vpop.permute.xlu1 %330  ;;  %v4084_v26 = vpop.permute.xlu0 %326 }
 0x128   :  { %5036 = vst [vmem:[#allocation53_spill] sm:$0xff] %v4082_v46  ;;  %v3743_v46 = vmov 1934713408  }
 0x129   :  { %571 = vbcast.lane.b32.xlu1 %v509_v10, 376  ;;  %567 = vbcast.lane.b32.xlu0 %v509_v10, 368 }
 0x12b   :  { %v4086_v25 = vpop.permute.xlu1 %338  ;;  %v4088_v61 = vpop.permute.xlu0 %334 }
 0x12c   :  { %5037 = vst [vmem:[#allocation54_spill] sm:$0xff] %v4086_v25  ;;  %5038 = vst [vmem:[#allocation55_spill] sm:$0xff] %v4088_v61 }
 0x12f   :  { %v4090_v62 = vpop.permute.xlu1 %346  ;;  %v4092_v44 = vpop.permute.xlu0 %342 }
 0x130   :  { %5039 = vst [vmem:[#allocation56_spill] sm:$0xff] %v4090_v62  ;;  %5040 = vst [vmem:[#allocation57_spill] sm:$0xff] %v4092_v44 }
 0x133   :  { %v4094_v51 = vpop.permute.xlu1 %354  ;;  %v4096_v23 = vpop.permute.xlu0 %350 }
 0x134   :  { %5041 = vst [vmem:[#allocation58_spill] sm:$0xff] %v4094_v51  ;;  %5042 = vst [vmem:[#allocation59_spill] sm:$0xff] %v4096_v23 }
 0x137   :  { %v4098_v59 = vpop.permute.xlu1 %362  ;;  %v4100_v41 = vpop.permute.xlu0 %358 }
 0x138   :  { %5043 = vst [vmem:[#allocation60_spill] sm:$0xff] %v4098_v59  ;;  %5044 = vst [vmem:[#allocation61_spill] sm:$0xff] %v4100_v41 }
 0x13b   :  { %v4102_v7 = vpop.permute.xlu1 %370  ;;  %v4104_v21 = vpop.permute.xlu0 %366 }
 0x13c   :  { %5045 = vst [vmem:[#allocation62_spill] sm:$0xff] %v4102_v7  ;;  %5046 = vst [vmem:[#allocation63_spill] sm:$0xff] %v4104_v21 }
 0x13f   :  { %v4106_v10 = vpop.permute.xlu1 %381  ;;  %v378_v57 = vpop.permute.xlu0 %377 }
 0x143   :  { %v4108_v39 = vpop.permute.xlu1 %389  ;;  %v4110_v27 = vpop.permute.xlu0 %385 }
 0x147   :  { %v4112_v22 = vpop.permute.xlu1 %397  ;;  %v4114_v51 = vpop.permute.xlu0 %393 }
 0x148   :  { %5047 = vst [vmem:[#allocation64_spill] sm:$0xff] %v4112_v22 }
 0x14b   :  { %v4116_v58 = vpop.permute.xlu1 %405  ;;  %v4118_v59 = vpop.permute.xlu0 %401 }
 0x14c   :  { %5048 = vst [vmem:[#allocation65_spill] sm:$0xff] %v4116_v58  ;;  %5049 = vst [vmem:[#allocation66_spill] sm:$0xff] %v4118_v59 }
 0x14f   :  { %v4120_v41 = vpop.permute.xlu1 %413  ;;  %v4122_v7 = vpop.permute.xlu0 %409 }
 0x150   :  { %5050 = vst [vmem:[#allocation67_spill] sm:$0xff] %v4122_v7 }
 0x153   :  { %v4124_v21 = vpop.permute.xlu1 %421  ;;  %v4126_v44 = vpop.permute.xlu0 %417 }
 0x154   :  { %5051 = vst [vmem:[#allocation68_spill] sm:$0xff] %v4124_v21 }
 0x157   :  { %v4128_v40 = vpop.permute.xlu1 %429  ;;  %v4130_v63 = vpop.permute.xlu0 %425 }
 0x158   :  { %5052 = vst [vmem:[#allocation69_spill] sm:$0xff] %v4128_v40  ;;  %5053 = vst [vmem:[#allocation70_spill] sm:$0xff] %v4130_v63 }
 0x15b   :  { %v4132_v19 = vpop.permute.xlu1 %437  ;;  %v4134_v55 = vpop.permute.xlu0 %433 }
 0x15c   :  { %5054 = vst [vmem:[#allocation71_spill] sm:$0xff] %v4132_v19  ;;  %5055 = vst [vmem:[#allocation72_spill] sm:$0xff] %v4134_v55 }
 0x15f   :  { %v4136_v25 = vpop.permute.xlu1 %448  ;;  %v445_v37 = vpop.permute.xlu0 %444 }
 0x163   :  { %v4138_v33 = vpop.permute.xlu1 %456  ;;  %v4140_v58 = vpop.permute.xlu0 %452 }
 0x167   :  { %v4142_v7 = vpop.permute.xlu1 %464  ;;  %v4144_v21 = vpop.permute.xlu0 %460 }
 0x168   :  { %5056 = vst [vmem:[#allocation73_spill] sm:$0xff] %v4142_v7  ;;  %v605_v7 = vcombine.low %v4076_v3, %v445_v37 }
 0x16a   :  { %v613_v34 = vrot.slane %v605_v7, %v4052_v54 }
 0x16b   :  { %v4146_v20 = vpop.permute.xlu1 %472  ;;  %v4148_v40 = vpop.permute.xlu0 %468 }
 0x16c   :  { %5057 = vst [vmem:[#allocation74_spill] sm:$0xff] %v4146_v20  ;;  %5058 = vst [vmem:[#allocation75_spill] sm:$0xff] %v4148_v40  ;;  %v640_v20 = vunpack.c.l.s4 %v3743_v46  ;;  %v589_v40 = vcombine.low %v3959_v30, %v4027_v4  ;;  %v606_v46 = vcombine.high %v4076_v3, %v445_v37  ;;  %v588_v3 = vrot.slane %v574_v24, %v4052_v54 }
 0x16f   :  { %v4150_v63 = vpop.permute.xlu1 %480  ;;  %v4152_v19 = vpop.permute.xlu0 %476 }
 0x170   :  { %5059 = vst [vmem:[#allocation76_spill] sm:$0xff] %v4150_v63  ;;  %5060 = vst [vmem:[#allocation77_spill] sm:$0xff] %v4152_v19 }
 0x173   :  { %v4154_v55 = vpop.permute.xlu1 %488  ;;  %v4156_v56 = vpop.permute.xlu0 %484 }
 0x174   :  { %5061 = vst [vmem:[#allocation78_spill] sm:$0xff] %v4154_v55 }
 0x177   :  { %v4158_v61 = vpop.permute.xlu1 %496  ;;  %v4160_v38 = vpop.permute.xlu0 %492 }
 0x178   :  { %5062 = vst [vmem:[#allocation79_spill] sm:$0xff] %v4158_v61  ;;  %5063 = vst [vmem:[#allocation80_spill] sm:$0xff] %v4160_v38  ;;  %v641_v38 = vunpack.c.0.s8 %v640_v20 }
 0x17b   :  { %v4162_v36 = vpop.permute.xlu1 %504  ;;  %v4164_v59 = vpop.permute.xlu0 %500 }
 0x17c   :  { %5064 = vst [vmem:[#allocation81_spill] sm:$0xff] %v4162_v36  ;;  %5065 = vst [vmem:[#allocation82_spill] sm:$0xff] %v4164_v59  ;;  %v590_v36 = vcombine.high %v3959_v30, %v4027_v4  ;;  %v597_v59 = vrot.slane %v589_v40, %v4052_v54  ;;  %v4186_v30 = vsub.s32 %v641_v38, %v3911_v1 }
 0x17e   :  { %v604_v37 = vrot.slane %v590_v36, %v4052_v54  ;;  %v637_v40 = vcombine.low %v581_v60, %v597_v59  ;;  %v638_v4 = vcombine.high %v581_v60, %v597_v59  ;;  %v725_v59 = vcombine.low %v3957_v29, %v4025_v2 }
 0x17f   :  { %v4169_v19 = vpop.permute.xlu1 %515  ;;  %v512_v55 = vpop.permute.xlu0 %511 }
 0x180   :  { %v621_v61 = vcombine.low %v378_v57, %v512_v55  ;;  %v622_v28 = vcombine.high %v378_v57, %v512_v55  ;;  %v652_v1 = vrot.slane %v638_v4, %v4186_v30  ;;  %v4199_v38 = vrot.slane %v637_v40, %v4186_v30 }
 0x181   :  { %v757_v24 = vcombine.low %v4106_v10, %v4169_v19  ;;  %v654_v40 = vcombine.high %v588_v3, %v604_v37 }
 0x182   :  { %v629_v8 = vrot.slane %v621_v61, %v4052_v54  ;;  %v636_v20 = vrot.slane %v622_v28, %v4052_v54  ;;  %v620_v61 = vrot.slane %v606_v46, %v4052_v54 }
 0x183   :  { %v4179_v22 = vpop.permute.xlu1 %523 }
 0x184   :  { %v669_v55 = vcombine.low %v613_v34, %v629_v8  ;;  %v670_v57 = vcombine.high %v613_v34, %v629_v8  ;;  %v685_v12 = vcombine.low %v620_v61, %v636_v20  ;;  %v653_v34 = vcombine.low %v588_v3, %v604_v37 }
 0x185   :  { %v686_v60 = vcombine.high %v620_v61, %v636_v20  ;;  %v1830_v20 = vcombine.high %v4090_v62, %v4150_v63  ;;  %v765_v61 = vrot.slane %v757_v24, %v4052_v54  ;;  %v668_v24 = vrot.slane %v654_v40, %v4186_v30 }
 0x186   :  { %v684_v48 = vrot.slane %v670_v57, %v4186_v30  ;;  %v4195_v28 = vrot.slane %v669_v55, %v4186_v30  ;;  %v693_v46 = vrot.slane %v685_v12, %v4186_v30  ;;  %v741_v55 = vcombine.low %v4074_v45, %v4136_v25 }
 0x187   :  { %v4190_v7 = vpop.permute.xlu1 %531  ;;  %v709_v57 = vcombine.low %v3929_v14, %v3991_v47  ;;  %v661_v4 = vrot.slane %v653_v34, %v4186_v30  ;;  %v733_v12 = vrot.slane %v725_v59, %v4052_v54  ;;  %v700_v37 = vrot.slane %v686_v60, %v4186_v30 }
 0x188   :  { %5066 = vst [vmem:[#allocation83_spill] sm:$0xff] %v4190_v7  ;;  %v703_v36 = vcombine.low %v652_v1, %v684_v48  ;;  %v702_v18 = vcombine.high %v4199_v38, %v4195_v28  ;;  %v749_v3 = vrot.slane %v741_v55, %v4052_v54  ;;  %v704_v34 = vcombine.high %v652_v1, %v684_v48 }
 0x189   :  { %v705_v7 = vcombine.low %v661_v4, %v693_v46  ;;  %v4231_v59 = vrot.slane %v1830_v20, %v4052_v54  ;;  %v707_v60 = vcombine.low %v668_v24, %v700_v37  ;;  %v726_v48 = vcombine.high %v3957_v29, %v4025_v2 }
 0x18a   :  { %2754 = vrot.lane.b32.xlu1 %v703_v36, %s3744_s1  ;;  %2750 = vrot.lane.b32.xlu0 %v702_v18, %s3745_s4  ;;  %v717_v36 = vrot.slane %v709_v57, %v4052_v54  ;;  %v805_v18 = vcombine.low %v749_v3, %v765_v61  ;;  %v710_v55 = vcombine.high %v3929_v14, %v3991_v47  ;;  %s3774_s1 = smov 93   ;;  %s3775_s4 = smov 96  }
 0x18b   :  { %v4201_v8 = vpop.permute.xlu1 %539  ;;  %v742_v40 = vcombine.high %v4074_v45, %v4136_v25  ;;  %v740_v2 = vrot.slane %v726_v48, %v4052_v54  ;;  %v708_v20 = vcombine.high %v668_v24, %v700_v37 }
 0x18c   :  { %5067 = vst [vmem:[#allocation84_spill] sm:$0xff] %v4201_v8  ;;  %v773_v63 = vcombine.low %v717_v36, %v733_v12  ;;  %v813_v57 = vrot.slane %v805_v18, %v4186_v30  ;;  %v724_v14 = vrot.slane %v710_v55, %v4052_v54 }
 0x18d   :  { %v756_v47 = vrot.slane %v742_v40, %v4052_v54 }
 0x18e   :  { %2762 = vrot.lane.b32.xlu1 %v705_v7, %s3746_s5  ;;  %2758 = vrot.lane.b32.xlu0 %v704_v34, %s3747_s6  ;;  %v706_v7 = vcombine.high %v661_v4, %v693_v46  ;;  %v781_v29 = vrot.slane %v773_v63, %v4186_v30  ;;  %v774_v46 = vcombine.high %v717_v36, %v733_v12  ;;  %v520_v4 = vpop.permute.xlu0 %519  ;;  %s3776_s5 = smov 99   ;;  %s3777_s6 = smov 102  }
 0x18f   :  { %v4215_v8 = vpop.permute.xlu1 %547  ;;  %v893_v18 = vcombine.low %v4110_v27, %v520_v4  ;;  %v789_v25 = vcombine.low %v724_v14, %v740_v2  ;;  %v861_v63 = vcombine.low %v3963_v32, %v4031_v6  ;;  %v845_v36 = vcombine.low %v3923_v11, %v3997_v50 }
 0x190   :  { %v1846_v23 = vcombine.high %v4120_v41, %v4215_v8  ;;  %v837_v34 = vcombine.low %v781_v29, %v813_v57  ;;  %v788_v45 = vrot.slane %v774_v46, %v4186_v30 }
 0x191   :  { %v797_v40 = vrot.slane %v789_v25, %v4186_v30  ;;  %v853_v46 = vrot.slane %v845_v36, %v4052_v54 }
 0x192   :  { %v4227_v62 = vrot.slane %v1846_v23, %v4052_v54  ;;  %v758_v23 = vcombine.high %v4106_v10, %v4169_v19  ;;  %2770 = vrot.lane.b32.xlu1 %v707_v60, %s3748_s7  ;;  %2766 = vrot.lane.b32.xlu0 %v706_v7, %s3749_s8  ;;  %v806_v10 = vcombine.high %v749_v3, %v765_v61  ;;  %s3778_s7 = smov 105   ;;  %s3779_s8 = smov 108  }
 0x193   :  { %v877_v61 = vcombine.low %v4080_v43, %v4140_v58  ;;  %v838_v3 = vcombine.high %v781_v29, %v813_v57  ;;  %v901_v60 = vrot.slane %v893_v18, %v4052_v54  ;;  %v790_v7 = vcombine.high %v724_v14, %v740_v2 }
 0x194   :  { %v1910_v1 = vcombine.high %v4231_v59, %v4227_v62  ;;  %v772_v19 = vrot.slane %v758_v23, %v4052_v54  ;;  %v820_v37 = vrot.slane %v806_v10, %v4186_v30  ;;  %v869_v23 = vrot.slane %v861_v63, %v4052_v54 }
 0x195   :  { %v885_v55 = vrot.slane %v877_v61, %v4052_v54  ;;  %v804_v18 = vrot.slane %v790_v7, %v4186_v30 }
 0x196   :  { %2774 = vrot.lane.b32.xlu0 %v708_v20, %s3750_s9  ;;  %2778 = vrot.lane.b32.xlu1 %v837_v34, %s3751_s10  ;;  %v821_v12 = vcombine.low %v756_v47, %v772_v19  ;;  %v822_v24 = vcombine.high %v756_v47, %v772_v19  ;;  %v839_v48 = vcombine.low %v788_v45, %v820_v37  ;;  %s3780_s9 = smov 111   ;;  %s3781_s10 = smov 114  }
 0x197   :  { %v840_v29 = vcombine.high %v788_v45, %v820_v37  ;;  %v894_v20 = vcombine.high %v4110_v27, %v520_v4  ;;  %v941_v19 = vcombine.low %v885_v55, %v901_v60  ;;  %v862_v34 = vcombine.high %v3963_v32, %v4031_v6 }
 0x198   :  { %v829_v57 = vrot.slane %v821_v12, %v4186_v30  ;;  %v836_v2 = vrot.slane %v822_v24, %v4186_v30  ;;  %v909_v14 = vcombine.low %v853_v46, %v869_v23  ;;  %v878_v47 = vcombine.high %v4080_v43, %v4140_v58 }
 0x199   :  { %v846_v27 = vcombine.high %v3923_v11, %v3997_v50  ;;  %v908_v4 = vrot.slane %v894_v20, %v4052_v54  ;;  %v942_v63 = vcombine.high %v885_v55, %v901_v60  ;;  %v949_v32 = vrot.slane %v941_v19, %v4186_v30 }
 0x19a   :  { %2782 = vrot.lane.b32.xlu0 %v838_v3, %s3752_s11  ;;  %2786 = vrot.lane.b32.xlu1 %v839_v48, %s3753_s12  ;;  %v841_v10 = vcombine.low %v797_v40, %v829_v57  ;;  %v842_v25 = vcombine.high %v797_v40, %v829_v57  ;;  %v843_v45 = vcombine.low %v804_v18, %v836_v2  ;;  %s3782_s11 = smov 117   ;;  %s3783_s12 = smov 120  }
 0x19b   :  { %v876_v6 = vrot.slane %v862_v34, %v4052_v54  ;;  %v910_v61 = vcombine.high %v853_v46, %v869_v23  ;;  %v892_v43 = vrot.slane %v878_v47, %v4052_v54  ;;  %v844_v58 = vcombine.high %v804_v18, %v836_v2  ;;  %v4295_v47 = vpop.permute.xlu0 %527 }
 0x19c   :  { %v917_v12 = vrot.slane %v909_v14, %v4186_v30  ;;  %v860_v11 = vrot.slane %v846_v27, %v4052_v54  ;;  %v1029_v50 = vcombine.low %v4108_v39, %v4179_v22  ;;  %v956_v36 = vrot.slane %v942_v63, %v4186_v30 }
 0x19d   :  { %v957_v37 = vcombine.low %v892_v43, %v908_v4  ;;  %v997_v24 = vcombine.low %v3961_v31, %v4029_v5  ;;  %v1013_v48 = vcombine.low %v4078_v0, %v4138_v33  ;;  %v924_v23 = vrot.slane %v910_v61, %v4186_v30 }
 0x19e   :  { %2790 = vrot.lane.b32.xlu0 %v840_v29, %s3754_s13  ;;  %2794 = vrot.lane.b32.xlu1 %v841_v10, %s3755_s14  ;;  %v973_v3 = vcombine.low %v917_v12, %v949_v32  ;;  %v925_v60 = vcombine.low %v860_v11, %v876_v6  ;;  %v974_v7 = vcombine.high %v917_v12, %v949_v32  ;;  %s3784_s13 = smov 123   ;;  %s3785_s14 = smov 126  }
 0x19f   :  { %v981_v55 = vcombine.low %v3927_v13, %v3995_v49  ;;  %v1037_v40 = vrot.slane %v1029_v50, %v4052_v54  ;;  %v958_v57 = vcombine.high %v892_v43, %v908_v4  ;;  %v975_v29 = vcombine.low %v924_v23, %v956_v36 }
 0x1a0   :  { %v965_v46 = vrot.slane %v957_v37, %v4186_v30  ;;  %v1005_v20 = vrot.slane %v997_v24, %v4052_v54  ;;  %v926_v19 = vcombine.high %v860_v11, %v876_v6  ;;  %v1021_v10 = vrot.slane %v1013_v48, %v4052_v54  ;;  %v4312_v11 = vpop.permute.xlu0 %535 }
 0x1a1   :  { %v976_v2 = vcombine.high %v924_v23, %v956_v36  ;;  %v933_v34 = vrot.slane %v925_v60, %v4186_v30  ;;  %v989_v14 = vrot.slane %v981_v55, %v4052_v54  ;;  %v1030_v18 = vcombine.high %v4108_v39, %v4179_v22 }
 0x1a2   :  { %2798 = vrot.lane.b32.xlu0 %v842_v25, %s3756_s15  ;;  %2802 = vrot.lane.b32.xlu1 %v843_v45, %s3757_s16  ;;  %v1077_v25 = vcombine.low %v1021_v10, %v1037_v40  ;;  %v972_v4 = vrot.slane %v958_v57, %v4186_v30  ;;  %v998_v63 = vcombine.high %v3961_v31, %v4029_v5  ;;  %s3786_s15 = smov 1   ;;  %s3787_s16 = smov 4  }
 0x1a3   :  { %v977_v27 = vcombine.low %v933_v34, %v965_v46  ;;  %v701_v45 = vcombine.low %v4199_v38, %v4195_v28  ;;  %v1045_v32 = vcombine.low %v989_v14, %v1005_v20  ;;  %v1014_v6 = vcombine.high %v4078_v0, %v4138_v33 }
 0x1a4   :  { %v978_v61 = vcombine.high %v933_v34, %v965_v46  ;;  %v940_v22 = vrot.slane %v926_v19, %v4186_v30  ;;  %v982_v39 = vcombine.high %v3927_v13, %v3995_v49  ;;  %v1044_v43 = vrot.slane %v1030_v18, %v4052_v54  ;;  %v4327_v57 = vpop.permute.xlu0 %543 }
 0x1a5   :  { %v1085_v5 = vrot.slane %v1077_v25, %v4186_v30  ;;  %v1012_v12 = vrot.slane %v998_v63, %v4052_v54  ;;  %v1046_v0 = vcombine.high %v989_v14, %v1005_v20  ;;  %v1028_v33 = vrot.slane %v1014_v6, %v4052_v54 }
 0x1a6   :  { %2806 = vrot.lane.b32.xlu0 %v844_v58, %s3758_s17  ;;  %2810 = vrot.lane.b32.xlu1 %v973_v3, %s3759_s18  ;;  %v1078_v58 = vcombine.high %v1021_v10, %v1037_v40  ;;  %v979_v31 = vcombine.low %v940_v22, %v972_v4  ;;  %v980_v50 = vcombine.high %v940_v22, %v972_v4  ;;  %s3788_s17 = smov 7   ;;  %s3789_s18 = smov 10  }
 0x1a7   :  { %v1053_v13 = vrot.slane %v1045_v32, %v4186_v30  ;;  %v996_v49 = vrot.slane %v982_v39, %v4052_v54  ;;  %v1093_v37 = vcombine.low %v1028_v33, %v1044_v43  ;;  %v1165_v3 = vcombine.low %v4114_v51, %v4295_v47 }
 0x1a8   :  { %v1092_v24 = vrot.slane %v1078_v58, %v4186_v30  ;;  %v1133_v60 = vcombine.low %v3968_v35, %v4036_v9  ;;  %v1060_v55 = vrot.slane %v1046_v0, %v4186_v30  ;;  %v1117_v40 = vcombine.low %v3934_v17, %v4002_v53  ;;  %v5068_v0 = vld [vmem:[#allocation59_spill] sm:$0xff] }
 0x1a9   :  { %v1109_v36 = vcombine.low %v1053_v13, %v1085_v5  ;;  %v1061_v48 = vcombine.low %v996_v49, %v1012_v12  ;;  %v1110_v23 = vcombine.high %v1053_v13, %v1085_v5  ;;  %v1173_v46 = vrot.slane %v1165_v3, %v4052_v54  ;;  %v5070_v3 = vld [vmem:[#allocation16_spill] sm:$0xff] }
 0x1aa   :  { %2814 = vrot.lane.b32.xlu0 %v974_v7, %s3760_s19  ;;  %2818 = vrot.lane.b32.xlu1 %v975_v29, %s3761_s20  ;;  %v1149_v7 = vcombine.low %v4084_v26, %v4144_v21  ;;  %v1094_v29 = vcombine.high %v1028_v33, %v1044_v43  ;;  %v1111_v20 = vcombine.low %v1060_v55, %v1092_v24  ;;  %s3790_s19 = smov 13   ;;  %s3791_s20 = smov 16  }
 0x1ab   :  { %v1101_v19 = vrot.slane %v1093_v37, %v4186_v30  ;;  %v1062_v10 = vcombine.high %v996_v49, %v1012_v12  ;;  %v1112_v14 = vcombine.high %v1060_v55, %v1092_v24  ;;  %v1069_v18 = vrot.slane %v1061_v48, %v4186_v30  ;;  %v5069_v37 = vld [vmem:[#allocation36_spill] sm:$0xff]  ;;  %v5071_v24 = vld [vmem:[#allocation83_spill] sm:$0xff] }
 0x1ac   :  { %v1157_v34 = vrot.slane %v1149_v7, %v4052_v54  ;;  %v1166_v25 = vcombine.high %v4114_v51, %v4295_v47  ;;  %v1108_v32 = vrot.slane %v1094_v29, %v4186_v30  ;;  %v1134_v6 = vcombine.high %v3968_v35, %v4036_v9 }
 0x1ad   :  { %v1113_v63 = vcombine.low %v1069_v18, %v1101_v19  ;;  %v1150_v39 = vcombine.high %v4084_v26, %v4144_v21  ;;  %v1114_v51 = vcombine.high %v1069_v18, %v1101_v19  ;;  %v1076_v47 = vrot.slane %v1062_v10, %v4186_v30 }
 0x1ae   :  { %2822 = vrot.lane.b32.xlu0 %v976_v2, %s3762_s21  ;;  %2826 = vrot.lane.b32.xlu1 %v977_v27, %s3763_s22  ;;  %v1141_v2 = vrot.slane %v1133_v60, %v4052_v54  ;;  %v1125_v27 = vrot.slane %v1117_v40, %v4052_v54  ;;  %v1213_v4 = vcombine.low %v1157_v34, %v1173_v46  ;;  %v5072_v60 = vld [vmem:[#allocation64_spill] sm:$0xff]  ;;  %s3792_s21 = smov 19   ;;  %s3793_s22 = smov 22  }
 0x1af   :  { %v1118_v43 = vcombine.high %v3934_v17, %v4002_v53  ;;  %v4348_v58 = vrot.slane %v1166_v25, %v4052_v54  ;;  %v1115_v9 = vcombine.low %v1076_v47, %v1108_v32  ;;  %v1253_v26 = vcombine.low %v3932_v16, %v4000_v52  ;;  %v5077_v25 = vld [vmem:[#allocation73_spill] sm:$0xff] }
 0x1b0   :  { %v1181_v22 = vcombine.low %v1125_v27, %v1141_v2  ;;  %v1221_v21 = vrot.slane %v1213_v4, %v4186_v30  ;;  %v1148_v5 = vrot.slane %v1134_v6, %v4052_v54  ;;  %v1182_v12 = vcombine.high %v1125_v27, %v1141_v2  ;;  %v5075_v2 = vld [vmem:[#allocation48_spill] sm:$0xff]  ;;  %v5078_v27 = vld [vmem:[#allocation53_spill] sm:$0xff] }
 0x1b1   :  { %v1950_v17 = vcombine.high %v3981_v42, %v4056_v15  ;;  %v1164_v53 = vrot.slane %v1150_v39, %v4052_v54  ;;  %v1966_v33 = vcombine.high %v5068_v0, %v4156_v56  ;;  %v1132_v49 = vrot.slane %v1118_v43, %v4052_v54 }
 0x1b2   :  { %2830 = vrot.lane.b32.xlu0 %v978_v61, %s3764_s23  ;;  %2834 = vrot.lane.b32.xlu1 %v979_v31, %s3765_s24  ;;  %v4340_v61 = vpop.permute.xlu0 %551  ;;  %v1214_v31 = vcombine.high %v1157_v34, %v1173_v46  ;;  %v1189_v13 = vrot.slane %v1181_v22, %v4186_v30  ;;  %v1301_v48 = vcombine.low %v5072_v60, %v5071_v24  ;;  %v5073_v46 = vld [vmem:[#allocation41_spill] sm:$0xff]  ;;  %v5076_v34 = vld [vmem:[#allocation47_spill] sm:$0xff]  ;;  %s3794_s23 = smov 25   ;;  %s3795_s24 = smov 28  }
 0x1b3   :  { %v1982_v35 = vcombine.high %v4126_v44, %v4340_v61  ;;  %v1909_v7 = vcombine.low %v4231_v59, %v4227_v62  ;;  %v1197_v10 = vcombine.low %v1132_v49, %v1148_v5  ;;  %v4379_v18 = vrot.slane %v1950_v17, %v4052_v54 }
 0x1b4   :  { %v1245_v40 = vcombine.low %v1189_v13, %v1221_v21  ;;  %v1228_v29 = vrot.slane %v1214_v31, %v4186_v30  ;;  %v1285_v4 = vcombine.low %v5078_v27, %v5077_v25  ;;  %v1196_v6 = vrot.slane %v1182_v12, %v4186_v30 }
 0x1b5   :  { %v4371_v55 = vrot.slane %v1982_v35, %v4052_v54  ;;  %v1309_v39 = vrot.slane %v1301_v48, %v4052_v54  ;;  %v1198_v12 = vcombine.high %v1132_v49, %v1148_v5  ;;  %v5079_v5 = vcombine.high %v5076_v34, %v5075_v2 }
 0x1b6   :  { %2838 = vrot.lane.b32.xlu0 %v980_v50, %s3766_s25  ;;  %2842 = vrot.lane.b32.xlu1 %v1109_v36, %s3767_s26  ;;  %v1116_v50 = vcombine.high %v1076_v47, %v1108_v32  ;;  %v1934_v36 = vcombine.high %v5070_v3, %v5069_v37  ;;  %v1246_v32 = vcombine.high %v1189_v13, %v1221_v21  ;;  %s3796_s25 = smov 31   ;;  %s3797_s26 = smov 34  }
 0x1b7   :  { %v1230_v47 = vcombine.high %v1164_v53, %v4348_v58  ;;  %v1247_v31 = vcombine.low %v1196_v6, %v1228_v29  ;;  %v1302_v13 = vcombine.high %v5072_v60, %v5071_v24  ;;  %v4415_v49 = vrot.slane %v5079_v5, %v4186_v30 }
 0x1b8   :  { %v4388_v22 = vrot.slane %v1934_v36, %v4052_v54  ;;  %v4421_v36 = vrot.slane %v1910_v1, %v4186_v30  ;;  %v1286_v62 = vcombine.high %v5078_v27, %v5077_v25 }
 0x1b9   :  { %v1244_v24 = vrot.slane %v1230_v47, %v4186_v30  ;;  %v5080_v47 = vld [vmem:[#allocation66_spill] sm:$0xff] }
 0x1ba   :  { %2846 = vrot.lane.b32.xlu0 %v1110_v23, %s3768_s27  ;;  %2850 = vrot.lane.b32.xlu1 %v1111_v20, %s3769_s28  ;;  %v1229_v23 = vcombine.low %v1164_v53, %v4348_v58  ;;  %v5074_v20 = vld [vmem:[#allocation21_spill] sm:$0xff]  ;;  %v1293_v58 = vrot.slane %v1285_v4, %v4052_v54  ;;  %v1248_v53 = vcombine.high %v1196_v6, %v1228_v29  ;;  %s3798_s27 = smov 37   ;;  %s3799_s28 = smov 40  }
 0x1bb   :  { %v1269_v19 = vcombine.low %v5074_v20, %v5073_v46  ;;  %v1212_v29 = vrot.slane %v1198_v12, %v4186_v30  ;;  %v5081_v12 = vld [vmem:[#allocation43_spill] sm:$0xff] }
 0x1bc   :  { %v1237_v35 = vrot.slane %v1229_v23, %v4186_v30  ;;  %v1349_v48 = vcombine.low %v1293_v58, %v1309_v39  ;;  %v1270_v23 = vcombine.high %v5074_v20, %v5073_v46  ;;  %v1316_v46 = vrot.slane %v1302_v13, %v4052_v54 }
 0x1bd   :  { %v1277_v21 = vrot.slane %v1269_v19, %v4052_v54  ;;  %v1931_v19 = vcombine.low %v4415_v49, %v4421_v36  ;;  %v1932_v20 = vcombine.high %v4415_v49, %v4421_v36 }
 0x1be   :  { %2854 = vrot.lane.b32.xlu0 %v1112_v14, %s3770_s29  ;;  %2858 = vrot.lane.b32.xlu1 %v1113_v63, %s3771_s30  ;;  %v1877_v14 = vcombine.low %v5076_v34, %v5075_v2  ;;  %v4384_v63 = vrot.slane %v1966_v33, %v4052_v54  ;;  %v2013_v33 = vcombine.low %v4388_v22, %v4379_v18  ;;  %s3800_s29 = smov 43   ;;  %s3801_s30 = smov 46  }
 0x1bf   :  { %v1350_v2 = vcombine.high %v1293_v58, %v1309_v39  ;;  %v1251_v34 = vcombine.low %v1212_v29, %v1244_v24  ;;  %v1284_v27 = vrot.slane %v1270_v23, %v4052_v54  ;;  %v5083_v58 = vld [vmem:[#allocation75_spill] sm:$0xff] }
 0x1c0   :  { %v2045_v43 = vcombine.low %v4384_v63, %v4371_v55  ;;  %v4401_v17 = vrot.slane %v1877_v14, %v4186_v30  ;;  %v4433_v1 = vrot.slane %v2013_v33, %v4186_v30  ;;  %v1357_v14 = vrot.slane %v1349_v48, %v4186_v30  ;;  %v5085_v48 = vld [vmem:[#allocation32_spill] sm:$0xff] }
 0x1c2   :  { %2862 = vrot.lane.b32.xlu0 %v1114_v51, %s3772_s0  ;;  %2866 = vrot.lane.b32.xlu1 %v1115_v9, %s3773_s3  ;;  %v4392_v51 = vrot.slane %v1909_v7, %v4186_v30  ;;  %v1261_v9 = vrot.slane %v1253_v26, %v4052_v54  ;;  %v4425_v60 = vrot.slane %v2045_v43, %v4186_v30  ;;  %s3802_s0 = smov 49   ;;  %s3803_s3 = smov 52  }
 0x1c3   :  { %v1437_v43 = vcombine.low %v5080_v47, %v4312_v11 }
 0x1c4   :  { %v1930_v26 = vcombine.high %v4401_v17, %v4392_v51  ;;  %v1318_v4 = vcombine.high %v1261_v9, %v1277_v21 }
 0x1c6   :  { %2870 = vrot.lane.b32.xlu0 %v1116_v50, %s3774_s1  ;;  %2874 = vrot.lane.b32.xlu1 %v1245_v40, %s3775_s4  ;;  %v1205_v50 = vrot.slane %v1197_v10, %v4186_v30  ;;  %v1317_v40 = vcombine.low %v1261_v9, %v1277_v21  ;;  %v1254_v10 = vcombine.high %v3932_v16, %v4000_v52  ;;  %v5082_v9 = vld [vmem:[#allocation23_spill] sm:$0xff]  ;;  %s3804_s1 = smov 55   ;;  %s3805_s4 = smov 58  }
 0x1c7   :  { %v1252_v16 = vcombine.high %v1212_v29, %v1244_v24  ;;  %v1405_v21 = vcombine.low %v5082_v9, %v5081_v12  ;;  %v1332_v5 = vrot.slane %v1318_v4, %v4186_v30 }
 0x1c8   :  { %v1249_v7 = vcombine.low %v1205_v50, %v1237_v35  ;;  %v1250_v59 = vcombine.high %v1205_v50, %v1237_v35  ;;  %v1325_v52 = vrot.slane %v1317_v40, %v4186_v30  ;;  %v1268_v6 = vrot.slane %v1254_v10, %v4052_v54 }
 0x1c9   :  { %v1364_v35 = vrot.slane %v1350_v2, %v4186_v30  ;;  %v1445_v40 = vrot.slane %v1437_v43, %v4052_v54  ;;  %v1413_v10 = vrot.slane %v1405_v21, %v4052_v54 }
 0x1ca   :  { %2878 = vrot.lane.b32.xlu0 %v1246_v32, %s3776_s5  ;;  %2882 = vrot.lane.b32.xlu1 %v1247_v31, %s3777_s6  ;;  %v1300_v32 = vrot.slane %v1286_v62, %v4052_v54  ;;  %v1381_v31 = vcombine.low %v1325_v52, %v1357_v14  ;;  %v1333_v33 = vcombine.low %v1268_v6, %v1284_v27  ;;  %s3806_s5 = smov 61   ;;  %s3807_s6 = smov 64  }
 0x1cb   :  { %v1382_v13 = vcombine.high %v1325_v52, %v1357_v14  ;;  %v1383_v29 = vcombine.low %v1332_v5, %v1364_v35  ;;  %v1406_v52 = vcombine.high %v5082_v9, %v5081_v12 }
 0x1cc   :  { %v1365_v39 = vcombine.low %v1300_v32, %v1316_v46  ;;  %v1366_v23 = vcombine.high %v1300_v32, %v1316_v46  ;;  %v1341_v14 = vrot.slane %v1333_v33, %v4186_v30  ;;  %v1438_v46 = vcombine.high %v5080_v47, %v4312_v11 }
 0x1cd   :  { %v1420_v9 = vrot.slane %v1406_v52, %v4052_v54 }
 0x1ce   :  { %2886 = vrot.lane.b32.xlu0 %v1248_v53, %s3778_s7  ;;  %2890 = vrot.lane.b32.xlu1 %v1249_v7, %s3779_s8  ;;  %v5084_v53 = vld [vmem:[#allocation55_spill] sm:$0xff]  ;;  %v5086_v7 = vld [vmem:[#allocation12_spill] sm:$0xff]  ;;  %v1373_v62 = vrot.slane %v1365_v39, %v4186_v30  ;;  %v1452_v47 = vrot.slane %v1438_v46, %v4052_v54  ;;  %s3808_s7 = smov 67   ;;  %s3809_s8 = smov 70  }
 0x1cf   :  { %v1421_v50 = vcombine.low %v5084_v53, %v5083_v58  ;;  %v1389_v24 = vcombine.low %v5086_v7, %v5085_v48  ;;  %v1422_v39 = vcombine.high %v5084_v53, %v5083_v58  ;;  %v1390_v11 = vcombine.high %v5086_v7, %v5085_v48  ;;  %v5088_v48 = vld [vmem:[#allocation65_spill] sm:$0xff] }
 0x1d0   :  { %v1386_v43 = vcombine.high %v1341_v14, %v1373_v62 }
 0x1d1   :  { %v1429_v2 = vrot.slane %v1421_v50, %v4052_v54  ;;  %v1397_v4 = vrot.slane %v1389_v24, %v4052_v54  ;;  %v1436_v58 = vrot.slane %v1422_v39, %v4052_v54  ;;  %v4492_v39 = vpop.permute.xlu1 %555 }
 0x1d2   :  { %2894 = vrot.lane.b32.xlu0 %v1250_v59, %s3780_s9  ;;  %2898 = vrot.lane.b32.xlu1 %v1251_v34, %s3781_s10  ;;  %v1334_v59 = vcombine.high %v1268_v6, %v1284_v27  ;;  %v1384_v34 = vcombine.high %v1332_v5, %v1364_v35  ;;  %v1380_v27 = vrot.slane %v1366_v23, %v4186_v30  ;;  %v5087_v5 = vld [vmem:[#allocation84_spill] sm:$0xff]  ;;  %s3810_s9 = smov 73   ;;  %s3811_s10 = smov 76  }
 0x1d3   :  { %v1485_v32 = vcombine.low %v1429_v2, %v1445_v40  ;;  %v1453_v6 = vcombine.low %v1397_v4, %v1413_v10  ;;  %v1486_v35 = vcombine.high %v1429_v2, %v1445_v40  ;;  %v1454_v33 = vcombine.high %v1397_v4, %v1413_v10  ;;  %v5091_v2 = vld [vmem:[#allocation74_spill] sm:$0xff] }
 0x1d4   :  { %v1573_v7 = vcombine.low %v5088_v48, %v5087_v5  ;;  %v1501_v24 = vcombine.low %v1436_v58, %v1452_v47 }
 0x1d5   :  { %v1493_v12 = vrot.slane %v1485_v32, %v4186_v30  ;;  %v1461_v50 = vrot.slane %v1453_v6, %v4186_v30  ;;  %v1500_v40 = vrot.slane %v1486_v35, %v4186_v30  ;;  %v1468_v46 = vrot.slane %v1454_v33, %v4186_v30  ;;  %v5093_v32 = vld [vmem:[#allocation31_spill] sm:$0xff] }
 0x1d6   :  { %2902 = vrot.lane.b32.xlu0 %v1252_v16, %s3782_s11  ;;  %2906 = vrot.lane.b32.xlu1 %v1381_v31, %s3783_s12  ;;  %v1385_v16 = vcombine.low %v1341_v14, %v1373_v62  ;;  %v1348_v31 = vrot.slane %v1334_v59, %v4186_v30  ;;  %v5090_v62 = vld [vmem:[#allocation22_spill] sm:$0xff]  ;;  %v1581_v52 = vrot.slane %v1573_v7, %v4052_v54  ;;  %s3812_s11 = smov 79   ;;  %s3813_s12 = smov 82  }
 0x1d7   :  { %v1517_v23 = vcombine.low %v1461_v50, %v1493_v12  ;;  %v1518_v4 = vcombine.high %v1461_v50, %v1493_v12  ;;  %v1502_v6 = vcombine.high %v1436_v58, %v1452_v47  ;;  %v1520_v12 = vcombine.high %v1468_v46, %v1500_v40 }
 0x1d8   :  { %v1387_v21 = vcombine.low %v1348_v31, %v1380_v27  ;;  %v1388_v53 = vcombine.high %v1348_v31, %v1380_v27  ;;  %v1509_v31 = vrot.slane %v1501_v24, %v4186_v30  ;;  %v1574_v47 = vcombine.high %v5088_v48, %v5087_v5 }
 0x1d9   :  { %v1516_v7 = vrot.slane %v1502_v6, %v4186_v30 }
 0x1da   :  { %2910 = vrot.lane.b32.xlu0 %v1382_v13, %s3784_s13  ;;  %2914 = vrot.lane.b32.xlu1 %v1383_v29, %s3785_s14  ;;  %v1404_v13 = vrot.slane %v1390_v11, %v4052_v54  ;;  %v5089_v29 = vld [vmem:[#allocation42_spill] sm:$0xff]  ;;  %s3814_s13 = smov 85   ;;  %s3815_s14 = smov 88  }
 0x1db   :  { %v1541_v59 = vcombine.low %v5090_v62, %v5089_v29 }
 0x1dc   :  { %v1469_v10 = vcombine.low %v1404_v13, %v1420_v9  ;;  %v1470_v35 = vcombine.high %v1404_v13, %v1420_v9  ;;  %v1542_v9 = vcombine.high %v5090_v62, %v5089_v29 }
 0x1dd   :  { %v1549_v11 = vrot.slane %v1541_v59, %v4052_v54  ;;  %v4511_v59 = vpop.permute.xlu0 %559 }
 0x1de   :  { %2918 = vrot.lane.b32.xlu0 %v1384_v34, %s3786_s15  ;;  %2922 = vrot.lane.b32.xlu1 %v1385_v16, %s3787_s16  ;;  %v5092_v34 = vld [vmem:[#allocation54_spill] sm:$0xff]  ;;  %v5094_v16 = vld [vmem:[#allocation11_spill] sm:$0xff]  ;;  %v1477_v33 = vrot.slane %v1469_v10, %v4186_v30  ;;  %v1484_v5 = vrot.slane %v1470_v35, %v4186_v30  ;;  %v1588_v10 = vrot.slane %v1574_v47, %v4052_v54  ;;  %v5096_v35 = vld [vmem:[#allocation45_spill] sm:$0xff]  ;;  %s3816_s15 = smov 91   ;;  %s3817_s16 = smov 94  }
 0x1df   :  { %v1557_v14 = vcombine.low %v5092_v34, %v5091_v2  ;;  %v1525_v27 = vcombine.low %v5094_v16, %v5093_v32  ;;  %v1558_v24 = vcombine.high %v5092_v34, %v5091_v2  ;;  %v1526_v48 = vcombine.high %v5094_v16, %v5093_v32  ;;  %v5098_v47 = vld [vmem:[#allocation77_spill] sm:$0xff] }
 0x1e0   :  { %v1521_v50 = vcombine.low %v1477_v33, %v1509_v31  ;;  %v1523_v29 = vcombine.low %v1484_v5, %v1516_v7  ;;  %v1556_v2 = vrot.slane %v1542_v9, %v4052_v54 }
 0x1e1   :  { %v1540_v16 = vrot.slane %v1526_v48, %v4052_v54 }
 0x1e2   :  { %2926 = vrot.lane.b32.xlu0 %v1386_v43, %s3788_s17  ;;  %2930 = vrot.lane.b32.xlu1 %v1387_v21, %s3789_s18  ;;  %v1519_v43 = vcombine.low %v1468_v46, %v1500_v40  ;;  %v1565_v21 = vrot.slane %v1557_v14, %v4052_v54  ;;  %v1522_v40 = vcombine.high %v1477_v33, %v1509_v31  ;;  %v4526_v33 = vpop.permute.xlu0 %567  ;;  %s3818_s17 = smov 97   ;;  %s3819_s18 = smov 100  }
 0x1e3   :  { %v1524_v46 = vcombine.high %v1484_v5, %v1516_v7 }
 0x1e4   :  { %v1621_v58 = vcombine.low %v1565_v21, %v1581_v52  ;;  %v1622_v14 = vcombine.high %v1565_v21, %v1581_v52  ;;  %v5095_v52 = vld [vmem:[#allocation67_spill] sm:$0xff]  ;;  %v5097_v21 = vld [vmem:[#allocation25_spill] sm:$0xff] }
 0x1e5   :  { %v1709_v6 = vcombine.low %v5095_v52, %v4327_v57 }
 0x1e6   :  { %2934 = vrot.lane.b32.xlu0 %v1388_v53, %s3790_s19  ;;  %2938 = vrot.lane.b32.xlu1 %v1517_v23, %s3791_s20  ;;  %v1533_v53 = vrot.slane %v1525_v27, %v4052_v54  ;;  %v4506_v23 = vpop.permute.xlu1 %563  ;;  %v1629_v62 = vrot.slane %v1621_v58, %v4186_v30  ;;  %v5099_v58 = vld [vmem:[#allocation57_spill] sm:$0xff]  ;;  %s3820_s19 = smov 127   ;;  %s3821_s20 = smov 2  }
 0x1e7   :  { %v4534_v48 = vrot.slane %v1709_v6, %v4052_v54  ;;  %v1710_v6 = vcombine.high %v5095_v52, %v4327_v57  ;;  %v1694_v28 = vcombine.high %v5099_v58, %v5098_v47 }
 0x1e8   :  { %v1589_v13 = vcombine.low %v1533_v53, %v1549_v11  ;;  %v1590_v34 = vcombine.high %v1533_v53, %v1549_v11  ;;  %v1636_v11 = vrot.slane %v1622_v14, %v4186_v30  ;;  %v1605_v53 = vcombine.low %v1540_v16, %v1556_v2 }
 0x1ea   :  { %2942 = vrot.lane.b32.xlu0 %v1518_v4, %s3792_s21  ;;  %2946 = vrot.lane.b32.xlu1 %v1519_v43, %s3793_s22  ;;  %v1572_v4 = vrot.slane %v1558_v24, %v4052_v54  ;;  %v1597_v32 = vrot.slane %v1589_v13, %v4186_v30  ;;  %v4521_v43 = vpop.permute.xlu1 %571  ;;  %v1604_v9 = vrot.slane %v1590_v34, %v4186_v30  ;;  %v5100_v13 = vld [vmem:[#allocation34_spill] sm:$0xff]  ;;  %s3822_s21 = smov 5   ;;  %s3823_s22 = smov 8  }
 0x1eb   :  { %v5101_v24 = vld [vmem:[#allocation14_spill] sm:$0xff] }
 0x1ec   :  { %v1637_v27 = vcombine.low %v1572_v4, %v1588_v10  ;;  %v1653_v31 = vcombine.low %v1597_v32, %v1629_v62  ;;  %v1654_v7 = vcombine.high %v1597_v32, %v1629_v62  ;;  %v1638_v5 = vcombine.high %v1572_v4, %v1588_v10 }
 0x1ed   :  { %v1655_v14 = vcombine.low %v1604_v9, %v1636_v11  ;;  %v1606_v32 = vcombine.high %v1540_v16, %v1556_v2  ;;  %v1613_v10 = vrot.slane %v1605_v53, %v4186_v30  ;;  %v1678_v53 = vcombine.high %v5097_v21, %v5096_v35 }
 0x1ee   :  { %2950 = vrot.lane.b32.xlu0 %v1520_v12, %s3794_s23  ;;  %2954 = vrot.lane.b32.xlu1 %v1521_v50, %s3795_s24  ;;  %v1677_v12 = vcombine.low %v5097_v21, %v5096_v35  ;;  %v1693_v50 = vcombine.low %v5099_v58, %v5098_v47  ;;  %s3824_s23 = smov 11   ;;  %s3825_s24 = smov 14  }
 0x1f0   :  { %v4538_v25 = vrot.slane %v1677_v12, %v4052_v54  ;;  %v1701_v34 = vrot.slane %v1693_v50, %v4052_v54  ;;  %v1620_v50 = vrot.slane %v1606_v32, %v4186_v30  ;;  %v1845_v32 = vcombine.low %v4120_v41, %v4215_v8 }
 0x1f2   :  { %2958 = vrot.lane.b32.xlu0 %v1522_v40, %s3796_s25  ;;  %2962 = vrot.lane.b32.xlu1 %v1523_v29, %s3797_s26  ;;  %v1661_v40 = vcombine.low %v5101_v24, %v5100_v13  ;;  %v1757_v2 = vcombine.low %v1701_v34, %v4534_v48  ;;  %v1758_v35 = vcombine.high %v1701_v34, %v4534_v48  ;;  %s3826_s25 = smov 17   ;;  %s3827_s26 = smov 20  }
 0x1f4   :  { %v1669_v4 = vrot.slane %v1661_v40, %v4052_v54  ;;  %v1765_v58 = vrot.slane %v1757_v2, %v4186_v30 }
 0x1f6   :  { %2966 = vrot.lane.b32.xlu0 %v1524_v46, %s3798_s27  ;;  %2970 = vrot.lane.b32.xlu1 %v1653_v31, %s3799_s28  ;;  %v1645_v46 = vrot.slane %v1637_v27, %v4186_v30  ;;  %v1656_v31 = vcombine.high %v1604_v9, %v1636_v11  ;;  %v1652_v11 = vrot.slane %v1638_v5, %v4186_v30  ;;  %s3828_s27 = smov 23   ;;  %s3829_s28 = smov 26  }
 0x1f7   :  { %v1725_v57 = vcombine.low %v1669_v4, %v4538_v25  ;;  %v4560_v9 = vrot.slane %v1710_v6, %v4052_v54  ;;  %v4565_v5 = vrot.slane %v1678_v53, %v4052_v54  ;;  %v5103_v6 = vld [vmem:[#allocation24_spill] sm:$0xff] }
 0x1f8   :  { %v1657_v16 = vcombine.low %v1613_v10, %v1645_v46  ;;  %v1659_v21 = vcombine.low %v1620_v50, %v1652_v11 }
 0x1f9   :  { %v1733_v48 = vrot.slane %v1725_v57, %v4186_v30 }
 0x1fa   :  { %2974 = vrot.lane.b32.xlu0 %v1654_v7, %s3800_s29  ;;  %2978 = vrot.lane.b32.xlu1 %v1655_v14, %s3801_s30  ;;  %v1662_v7 = vcombine.high %v5101_v24, %v5100_v13  ;;  %v1726_v14 = vcombine.high %v1669_v4, %v4538_v25  ;;  %v1708_v24 = vrot.slane %v1694_v28, %v4052_v54  ;;  %v5102_v4 = vld [vmem:[#allocation44_spill] sm:$0xff]  ;;  %v5106_v28 = vld [vmem:[#allocation33_spill] sm:$0xff]  ;;  %s3830_s29 = smov 29   ;;  %s3831_s30 = smov 32  }
 0x1fb   :  { %v1789_v25 = vcombine.low %v1733_v48, %v1765_v58  ;;  %v1790_v57 = vcombine.high %v1733_v48, %v1765_v58 }
 0x1fc   :  { %v2755_v29 = vpop.permute.xlu1 %2754  ;;  %v2751_v62 = vpop.permute.xlu0 %2750 }
 0x1fd   :  { %v3258_v27 = vsel %vm3257_vm0, %v701_v45, %v2751_v62  ;;  %v1658_v45 = vcombine.high %v1613_v10, %v1645_v46  ;;  %v1660_v46 = vcombine.high %v1620_v50, %v1652_v11  ;;  %v1676_v62 = vrot.slane %v1662_v7, %v4052_v54  ;;  %v5105_v11 = vld [vmem:[#allocation56_spill] sm:$0xff] }
 0x1fe   :  { %2982 = vrot.lane.b32.xlu0 %v1656_v31, %s3802_s0  ;;  %2986 = vrot.lane.b32.xlu1 %v1657_v16, %s3803_s3  ;;  %v3260_v38 = vsel %vm3259_vm1, %v3258_v27, %v2755_v29  ;;  %v1773_v31 = vcombine.low %v1708_v24, %v4560_v9  ;;  %v1772_v10 = vrot.slane %v1758_v35, %v4186_v30  ;;  %vm3289_vm0 = vcmask 416768   ;;  %s3832_s0 = smov 35   ;;  %s3833_s3 = smov 38  }
 0x1ff   :  { %v1813_v27 = vcombine.low %v5103_v6, %v5102_v4  ;;  %v1741_v2 = vcombine.low %v1676_v62, %v4565_v5  ;;  %v1853_v50 = vrot.slane %v1845_v32, %v4052_v54  ;;  %v1742_v58 = vcombine.high %v1676_v62, %v4565_v5 }
 0x200   :  { %v2763_v12 = vpop.permute.xlu1 %2762  ;;  %v2759_v52 = vpop.permute.xlu0 %2758  ;;  %vm3291_vm1 = vcmask 441344  }
 0x201   :  { %v3262_v40 = vsel %vm3261_vm2, %v3260_v38, %v2759_v52  ;;  %v1740_v52 = vrot.slane %v1726_v14, %v4186_v30  ;;  %v5107_v38 = vld [vmem:[#allocation13_spill] sm:$0xff]  ;;  %v1749_v48 = vrot.slane %v1741_v2, %v4186_v30  ;;  %v1756_v6 = vrot.slane %v1742_v58, %v4186_v30  ;;  %v5111_v58 = vld [vmem:[#allocation78_spill] sm:$0xff] }
 0x202   :  { %2990 = vrot.lane.b32.xlu0 %v1658_v45, %s3804_s1  ;;  %2994 = vrot.lane.b32.xlu1 %v1659_v21, %s3805_s4  ;;  %v3264_v29 = vsel %vm3263_vm3, %v3262_v40, %v2763_v12  ;;  %v5104_v12 = vld [vmem:[#allocation76_spill] sm:$0xff]  ;;  %v1797_v45 = vcombine.low %v5107_v38, %v5106_v28  ;;  %v1774_v40 = vcombine.high %v1708_v24, %v4560_v9  ;;  %vm3293_vm2 = vcmask 465920   ;;  %s3834_s1 = smov 41   ;;  %s3835_s4 = smov 44  }
 0x203   :  { %v1829_v53 = vcombine.low %v5105_v11, %v5104_v12  ;;  %v1791_v35 = vcombine.low %v1740_v52, %v1772_v10  ;;  %v1781_v21 = vrot.slane %v1773_v31, %v4186_v30  ;;  %v5108_v38 = vld [vmem:[#allocation68_spill] sm:$0xff]  ;;  %vm3295_vm3 = vcmask 490496  }
 0x204   :  { %v2771_v47 = vpop.permute.xlu1 %2770  ;;  %v2767_v13 = vpop.permute.xlu0 %2766  ;;  %v1805_v9 = vrot.slane %v1797_v45, %v4052_v54  ;;  %v1788_v5 = vrot.slane %v1774_v40, %v4186_v30  ;;  %v2117_v45 = vcombine.low %v5108_v38, %v4492_v39 }
 0x205   :  { %v3266_v34 = vsel %vm3265_vm4, %v3264_v29, %v2767_v13  ;;  %v1837_v14 = vrot.slane %v1829_v53, %v4052_v54  ;;  %v1793_v31 = vcombine.low %v1749_v48, %v1781_v21  ;;  %vm3297_vm4 = vcmask 515072  }
 0x206   :  { %2998 = vrot.lane.b32.xlu0 %v1660_v46, %s3806_s5  ;;  %3002 = vrot.lane.b32.xlu1 %v1789_v25, %s3807_s6  ;;  %v3268_v8 = vsel %vm3267_vm5, %v3266_v34, %v2771_v47  ;;  %v1821_v47 = vrot.slane %v1813_v27, %v4052_v54  ;;  %v1792_v46 = vcombine.high %v1740_v52, %v1772_v10  ;;  %vm3299_vm5 = vcmask 539648   ;;  %s3836_s5 = smov 47   ;;  %s3837_s6 = smov 50  }
 0x207   :  { %v1893_v32 = vcombine.low %v1837_v14, %v1853_v50  ;;  %v1794_v10 = vcombine.high %v1749_v48, %v1781_v21  ;;  %v1894_v2 = vcombine.high %v1837_v14, %v1853_v50  ;;  %v1795_v12 = vcombine.low %v1756_v6, %v1788_v5  ;;  %v5110_v21 = vld [vmem:[#allocation26_spill] sm:$0xff] }
 0x208   :  { %v2775_v16 = vpop.permute.xlu0 %2774  ;;  %v2779_v41 = vpop.permute.xlu1 %2778  ;;  %v1861_v62 = vcombine.low %v1805_v9, %v1821_v47  ;;  %v1862_v53 = vcombine.high %v1805_v9, %v1821_v47  ;;  %v5112_v14 = vld [vmem:[#allocation58_spill] sm:$0xff] }
 0x209   :  { %v3270_v7 = vsel %vm3269_vm6, %v3268_v8, %v2775_v16  ;;  %v1901_v11 = vrot.slane %v1893_v32, %v4186_v30  ;;  %v1908_v40 = vrot.slane %v1894_v2, %v4186_v30  ;;  %v5114_v32 = vld [vmem:[#allocation15_spill] sm:$0xff]  ;;  %vm3301_vm6 = vcmask 564224  }
 0x20a   :  { %3006 = vrot.lane.b32.xlu0 %v1790_v57, %s3808_s7  ;;  %3010 = vrot.lane.b32.xlu1 %v1791_v35, %s3809_s8  ;;  %v3272_v13 = vsel %vm3271_vm7, %v3270_v7, %v2779_v41  ;;  %v1796_v57 = vcombine.high %v1756_v6, %v1788_v5  ;;  %v1869_v52 = vrot.slane %v1861_v62, %v4186_v30  ;;  %v5109_v35 = vld [vmem:[#allocation46_spill] sm:$0xff]  ;;  %vm3303_vm7 = vcmask 588800   ;;  %s3838_s7 = smov 53   ;;  %s3839_s8 = smov 56  }
 0x20b   :  { %v2085_v47 = vcombine.low %v5110_v21, %v5109_v35  ;;  %v1876_v9 = vrot.slane %v1862_v53, %v4186_v30  ;;  %v4606_v5 = vrot.slane %v2117_v45, %v4052_v54  ;;  %v2046_v62 = vcombine.high %v4384_v63, %v4371_v55 }
 0x20c   :  { %v2783_v29 = vpop.permute.xlu0 %2782  ;;  %v2787_v34 = vpop.permute.xlu1 %2786  ;;  %v1925_v7 = vcombine.low %v1869_v52, %v1901_v11  ;;  %v1926_v48 = vcombine.high %v1869_v52, %v1901_v11  ;;  %v2014_v6 = vcombine.high %v4388_v22, %v4379_v18  ;;  %v2118_v63 = vcombine.high %v5108_v38, %v4492_v39 }
 0x20d   :  { %v3274_v24 = vsel %vm3273_vm8, %v3272_v13, %v2783_v29  ;;  %v2101_v13 = vcombine.low %v5112_v14, %v5111_v58  ;;  %v1929_v18 = vcombine.low %v4401_v17, %v4392_v51  ;;  %v2060_v22 = vrot.slane %v2046_v62, %v4186_v30 }
 0x20e   :  { %3014 = vrot.lane.b32.xlu0 %v1792_v46, %s3810_s9  ;;  %3018 = vrot.lane.b32.xlu1 %v1793_v31, %s3811_s10  ;;  %v3276_v25 = vsel %vm3275_vm9, %v3274_v24, %v2787_v34  ;;  %v5113_v24 = vld [vmem:[#allocation35_spill] sm:$0xff]  ;;  %v2102_v39 = vcombine.high %v5112_v14, %v5111_v58  ;;  %v2028_v38 = vrot.slane %v2014_v6, %v4186_v30  ;;  %vm3305_vm8 = vcmask 613376   ;;  %s3840_s9 = smov 59   ;;  %s3841_s10 = smov 62  }
 0x20f   :  { %v2069_v34 = vcombine.low %v5114_v32, %v5113_v24  ;;  %v2066_v45 = vcombine.high %v4433_v1, %v4425_v60  ;;  %vm3307_vm9 = vcmask 637952  }
 0x210   :  { %v2791_v4 = vpop.permute.xlu0 %2790  ;;  %v2795_v16 = vpop.permute.xlu1 %2794 }
 0x211   :  { %v3278_v27 = vsel %vm3277_vm10, %v3276_v25, %v2791_v4  ;;  %v1927_v4 = vcombine.low %v1876_v9, %v1908_v40  ;;  %v2077_v55 = vrot.slane %v2069_v34, %v4052_v54  ;;  %v5115_v34 = vld [vmem:[#allocation70_spill] sm:$0xff]  ;;  %vm3309_vm10 = vcmask 662528  }
 0x212   :  { %3022 = vrot.lane.b32.xlu0 %v1794_v10, %s3812_s11  ;;  %3026 = vrot.lane.b32.xlu1 %v1795_v12, %s3813_s12  ;;  %v3280_v41 = vsel %vm3279_vm11, %v3278_v27, %v2795_v16  ;;  %v4611_v10 = vrot.slane %v2085_v47, %v4052_v54  ;;  %v2109_v27 = vrot.slane %v2101_v13, %v4052_v54  ;;  %vm3311_vm11 = vcmask 687104   ;;  %s3842_s11 = smov 65   ;;  %s3843_s12 = smov 68  }
 0x213   :  { %v1928_v12 = vcombine.high %v1876_v9, %v1908_v40  ;;  %v2067_v47 = vcombine.low %v2028_v38, %v2060_v22 }
 0x214   :  { %v2799_v8 = vpop.permute.xlu0 %2798  ;;  %v2803_v50 = vpop.permute.xlu1 %2802  ;;  %v2165_v53 = vcombine.low %v2109_v27, %v4606_v5  ;;  %v2134_v13 = vcombine.high %v2077_v55, %v4611_v10 }
 0x215   :  { %v3282_v28 = vsel %vm3281_vm12, %v3280_v41, %v2799_v8  ;;  %v2086_v8 = vcombine.high %v5110_v21, %v5109_v35  ;;  %v2166_v35 = vcombine.high %v2109_v27, %v4606_v5  ;;  %v5116_v27 = vld [vmem:[#allocation50_spill] sm:$0xff]  ;;  %vm3313_vm12 = vcmask 711680  }
 0x216   :  { %3030 = vrot.lane.b32.xlu0 %v1796_v57, %s3814_s13  ;;  %3034 = vrot.lane.b32.xlu1 %v1925_v7, %s3815_s14  ;;  %v3284_v29 = vsel %vm3283_vm13, %v3282_v28, %v2803_v50  ;;  %v2133_v57 = vcombine.low %v2077_v55, %v4611_v10  ;;  %v2070_v50 = vcombine.high %v5114_v32, %v5113_v24  ;;  %v5119_v55 = vld [vmem:[#allocation61_spill] sm:$0xff]  ;;  %vm3315_vm13 = vcmask 736256   ;;  %s3844_s13 = smov 71   ;;  %s3845_s14 = smov 74  }
 0x217   :  { %v4634_v7 = vrot.slane %v2118_v63, %v4052_v54  ;;  %v2173_v58 = vrot.slane %v2165_v53, %v4186_v30  ;;  %v4639_v14 = vrot.slane %v2086_v8, %v4052_v54  ;;  %v2068_v24 = vcombine.high %v2028_v38, %v2060_v22  ;;  %v5120_v22 = vld [vmem:[#allocation38_spill] sm:$0xff] }
 0x218   :  { %v2807_v46 = vpop.permute.xlu0 %2806  ;;  %v2811_v25 = vpop.permute.xlu1 %2810  ;;  %v2141_v9 = vrot.slane %v2133_v57, %v4186_v30  ;;  %v2084_v32 = vrot.slane %v2070_v50, %v4052_v54  ;;  %v2180_v10 = vrot.slane %v2166_v35, %v4186_v30  ;;  %v5121_v8 = vld [vmem:[#allocation18_spill] sm:$0xff] }
 0x219   :  { %v3286_v31 = vsel %vm3285_vm14, %v3284_v29, %v2807_v46  ;;  %v2116_v29 = vrot.slane %v2102_v39, %v4052_v54  ;;  %v2205_v57 = vcombine.low %v5121_v8, %v5120_v22  ;;  %vm3317_vm14 = vcmask 760832  }
 0x21a   :  { %3038 = vrot.lane.b32.xlu0 %v1926_v48, %s3816_s15  ;;  %3042 = vrot.lane.b32.xlu1 %v1927_v4, %s3817_s16  ;;  %v3288_v2 = vsel %vm3287_vm15, %v3286_v31, %v2811_v25  ;;  %v2253_v31 = vcombine.low %v5115_v34, %v4511_v59  ;;  %v2197_v4 = vcombine.low %v2141_v9, %v2173_v58  ;;  %vm3319_vm15 = vcmask 785408   ;;  %s3846_s15 = smov 77   ;;  %s3847_s16 = smov 80  }
 0x21b   :  { %v2181_v62 = vcombine.low %v2116_v29, %v4634_v7  ;;  %v2149_v6 = vcombine.low %v2084_v32, %v4639_v14  ;;  %v2182_v39 = vcombine.high %v2116_v29, %v4634_v7  ;;  %v2213_v29 = vrot.slane %v2205_v57, %v4052_v54 }
 0x21c   :  { %v2815_v16 = vpop.permute.xlu0 %2814  ;;  %v2819_v41 = vpop.permute.xlu1 %2818 }
 0x21d   :  { %v3290_v11 = vsel %vm3289_vm0, %v3288_v2, %v2815_v16  ;;  %v5117_v2 = vld [vmem:[#allocation28_spill] sm:$0xff]  ;;  %v2189_v50 = vrot.slane %v2181_v62, %v4186_v30  ;;  %vm3321_vm0 = vcmask 809984  }
 0x21e   :  { %3046 = vrot.lane.b32.xlu0 %v1928_v12, %s3818_s17  ;;  %3050 = vrot.lane.b32.xlu1 %v1929_v18, %s3819_s18  ;;  %v3292_v52 = vsel %vm3291_vm1, %v3290_v11, %v2819_v41  ;;  %v2221_v16 = vcombine.low %v5117_v2, %v5116_v27  ;;  %v5118_v12 = vld [vmem:[#allocation80_spill] sm:$0xff]  ;;  %v2148_v41 = vrot.slane %v2134_v13, %v4186_v30  ;;  %vm3323_vm1 = vcmask 834560   ;;  %s3848_s17 = smov 83   ;;  %s3849_s18 = smov 86  }
 0x21f   :  { %v2237_v63 = vcombine.low %v5119_v55, %v5118_v12  ;;  %v2198_v18 = vcombine.high %v2141_v9, %v2173_v58  ;;  %v2157_v58 = vrot.slane %v2149_v6, %v4186_v30  ;;  %v2238_v62 = vcombine.high %v5119_v55, %v5118_v12 }
 0x220   :  { %v2823_v28 = vpop.permute.xlu0 %2822  ;;  %v2827_v21 = vpop.permute.xlu1 %2826  ;;  %v4664_v35 = vrot.slane %v2221_v16, %v4052_v54  ;;  %v2200_v13 = vcombine.high %v2148_v41, %v2180_v10 }
 0x221   :  { %v3294_v40 = vsel %vm3293_vm2, %v3292_v52, %v2823_v28  ;;  %v4659_v28 = vrot.slane %v2253_v31, %v4052_v54  ;;  %v2222_v31 = vcombine.high %v5117_v2, %v5116_v27  ;;  %vm3325_vm2 = vcmask 859136  }
 0x222   :  { %3086 = vrot.lane.b32.xlu0 %v2066_v45, %s3820_s19  ;;  %3090 = vrot.lane.b32.xlu1 %v2067_v47, %s3821_s20  ;;  %v3296_v46 = vsel %vm3295_vm3, %v3294_v40, %v2827_v21  ;;  %v2199_v45 = vcombine.low %v2148_v41, %v2180_v10  ;;  %v2150_v40 = vcombine.high %v2084_v32, %v4639_v14  ;;  %vm3327_vm3 = vcmask 883712   ;;  %s3850_s19 = smov 89   ;;  %s3851_s20 = smov 92  }
 0x223   :  { %v2245_v21 = vrot.slane %v2237_v63, %v4052_v54  ;;  %v2196_v32 = vrot.slane %v2182_v39, %v4186_v30  ;;  %v2206_v10 = vcombine.high %v5121_v8, %v5120_v22  ;;  %v4687_v55 = vrot.slane %v2222_v31, %v4052_v54  ;;  %v5122_v39 = vld [vmem:[#allocation69_spill] sm:$0xff] }
 0x224   :  { %v2831_v48 = vpop.permute.xlu0 %2830  ;;  %v2835_v25 = vpop.permute.xlu1 %2834 }
 0x225   :  { %v3298_v5 = vsel %vm3297_vm4, %v3296_v46, %v2831_v48  ;;  %v2254_v46 = vcombine.high %v5115_v34, %v4511_v59  ;;  %v2301_v14 = vcombine.low %v2245_v21, %v4659_v28  ;;  %v2302_v27 = vcombine.high %v2245_v21, %v4659_v28  ;;  %v5124_v21 = vld [vmem:[#allocation27_spill] sm:$0xff] }
 0x226   :  { %3094 = vrot.lane.b32.xlu0 %v2068_v24, %s3822_s21  ;;  %3098 = vrot.lane.b32.xlu1 %v2197_v4, %s3823_s22  ;;  %v3300_v11 = vsel %vm3299_vm5, %v3298_v5, %v2835_v25  ;;  %v2201_v24 = vcombine.low %v2157_v58, %v2189_v50  ;;  %v2269_v5 = vcombine.low %v2213_v29, %v4664_v35  ;;  %vm3329_vm4 = vcmask 908288   ;;  %s3852_s21 = smov 95   ;;  %s3853_s22 = smov 98  }
 0x227   :  { %v2164_v25 = vrot.slane %v2150_v40, %v4186_v30  ;;  %v2202_v4 = vcombine.high %v2157_v58, %v2189_v50  ;;  %v4682_v6 = vrot.slane %v2254_v46, %v4052_v54  ;;  %v2309_v12 = vrot.slane %v2301_v14, %v4186_v30  ;;  %v5125_v58 = vld [vmem:[#allocation79_spill] sm:$0xff] }
 0x228   :  { %v2839_v53 = vpop.permute.xlu0 %2838  ;;  %v2843_v38 = vpop.permute.xlu1 %2842  ;;  %v2277_v8 = vrot.slane %v2269_v5, %v4186_v30  ;;  %v2220_v57 = vrot.slane %v2206_v10, %v4052_v54  ;;  %v2316_v40 = vrot.slane %v2302_v27, %v4186_v30  ;;  %vm3331_vm5 = vcmask 932864  }
 0x229   :  { %v3302_v52 = vsel %vm3301_vm6, %v3300_v11, %v2839_v53  ;;  %v2203_v63 = vcombine.low %v2164_v25, %v2196_v32  ;;  %v2270_v11 = vcombine.high %v2213_v29, %v4664_v35  ;;  %v2252_v53 = vrot.slane %v2238_v62, %v4052_v54  ;;  %v5123_v35 = vld [vmem:[#allocation49_spill] sm:$0xff] }
 0x22a   :  { %3102 = vrot.lane.b32.xlu0 %v2198_v18, %s3824_s23  ;;  %3106 = vrot.lane.b32.xlu1 %v2199_v45, %s3825_s24  ;;  %v3304_v7 = vsel %vm3303_vm7, %v3302_v52, %v2843_v38  ;;  %v2204_v22 = vcombine.high %v2164_v25, %v2196_v32  ;;  %v2389_v52 = vcombine.low %v5122_v39, %v4506_v23  ;;  %v5128_v32 = vld [vmem:[#allocation17_spill] sm:$0xff]  ;;  %vm3333_vm6 = vcmask 957440   ;;  %s3854_s23 = smov 103   ;;  %s3855_s24 = smov 101  }
 0x22b   :  { %v2317_v38 = vcombine.low %v2252_v53, %v4682_v6  ;;  %v2333_v50 = vcombine.low %v2277_v8, %v2309_v12  ;;  %v2334_v14 = vcombine.high %v2277_v8, %v2309_v12  ;;  %vm3335_vm7 = vcmask 982016  }
 0x22c   :  { %v2847_v47 = vpop.permute.xlu0 %2846  ;;  %v2851_v9 = vpop.permute.xlu1 %2850  ;;  %v4706_v5 = vrot.slane %v2389_v52, %v4052_v54 }
 0x22d   :  { %v3306_v48 = vsel %vm3305_vm8, %v3304_v7, %v2847_v47  ;;  %v2357_v7 = vcombine.low %v5124_v21, %v5123_v35  ;;  %v2285_v47 = vcombine.low %v2220_v57, %v4687_v55  ;;  %vm3337_vm8 = vcmask 1006592  }
 0x22e   :  { %3110 = vrot.lane.b32.xlu0 %v2200_v13, %s3826_s25  ;;  %3114 = vrot.lane.b32.xlu1 %v2201_v24, %s3827_s26  ;;  %v3308_v59 = vsel %vm3307_vm9, %v3306_v48, %v2851_v9  ;;  %v5126_v13 = vld [vmem:[#allocation60_spill] sm:$0xff]  ;;  %v2284_v9 = vrot.slane %v2270_v11, %v4186_v30  ;;  %v5127_v24 = vld [vmem:[#allocation37_spill] sm:$0xff]  ;;  %vm3339_vm9 = vcmask 1031168   ;;  %s3856_s25 = smov 106   ;;  %s3857_s26 = smov 104  }
 0x22f   :  { %v2373_v29 = vcombine.low %v5126_v13, %v5125_v58  ;;  %v2341_v31 = vcombine.low %v5128_v32, %v5127_v24  ;;  %v4711_v10 = vrot.slane %v2357_v7, %v4052_v54  ;;  %v2374_v52 = vcombine.high %v5126_v13, %v5125_v58 }
 0x230   :  { %v2855_v34 = vpop.permute.xlu0 %2854  ;;  %v2859_v2 = vpop.permute.xlu1 %2858  ;;  %v2335_v25 = vcombine.low %v2284_v9, %v2316_v40  ;;  %v2336_v12 = vcombine.high %v2284_v9, %v2316_v40 }
 0x231   :  { %v3310_v16 = vsel %vm3309_vm10, %v3308_v59, %v2855_v34  ;;  %v2318_v59 = vcombine.high %v2252_v53, %v4682_v6  ;;  %v2381_v27 = vrot.slane %v2373_v29, %v4052_v54  ;;  %v2293_v6 = vrot.slane %v2285_v47, %v4186_v30 }
 0x232   :  { %3118 = vrot.lane.b32.xlu0 %v2202_v4, %s3828_s27  ;;  %3122 = vrot.lane.b32.xlu1 %v2203_v63, %s3829_s28  ;;  %v3312_v41 = vsel %vm3311_vm11, %v3310_v16, %v2859_v2  ;;  %v2325_v4 = vrot.slane %v2317_v38, %v4186_v30  ;;  %v2286_v16 = vcombine.high %v2220_v57, %v4687_v55  ;;  %vm3341_vm10 = vcmask 7168   ;;  %s3858_s27 = smov 109   ;;  %s3859_s28 = smov 107  }
 0x233   :  { %v2349_v11 = vrot.slane %v2341_v31, %v4052_v54  ;;  %v2390_v53 = vcombine.high %v5122_v39, %v4506_v23  ;;  %v2332_v8 = vrot.slane %v2318_v59, %v4186_v30  ;;  %v2358_v57 = vcombine.high %v5124_v21, %v5123_v35 }
 0x234   :  { %v2863_v18 = vpop.permute.xlu0 %2862  ;;  %v2867_v45 = vpop.permute.xlu1 %2866  ;;  %v2337_v55 = vcombine.low %v2293_v6, %v2325_v4  ;;  %v2338_v38 = vcombine.high %v2293_v6, %v2325_v4  ;;  %v2438_v35 = vcombine.high %v2381_v27, %v4706_v5  ;;  %v2388_v29 = vrot.slane %v2374_v52, %v4052_v54 }
 0x235   :  { %v3314_v28 = vsel %vm3313_vm12, %v3312_v41, %v2863_v18  ;;  %v2437_v18 = vcombine.low %v2381_v27, %v4706_v5  ;;  %v4730_v40 = vrot.slane %v2390_v53, %v4052_v54  ;;  %v4735_v13 = vrot.slane %v2358_v57, %v4052_v54  ;;  %v5131_v27 = vld [vmem:[#allocation30_spill] sm:$0xff] }
 0x236   :  { %3126 = vrot.lane.b32.xlu0 %v2204_v22, %s3830_s29  ;;  %3130 = vrot.lane.b32.xlu1 %v2333_v50, %s3831_s30  ;;  %v3316_v46 = vsel %vm3315_vm13, %v3314_v28, %v2867_v45  ;;  %v2405_v28 = vcombine.low %v2349_v11, %v4711_v10  ;;  %v2300_v45 = vrot.slane %v2286_v16, %v4186_v30  ;;  %v5130_v16 = vld [vmem:[#allocation52_spill] sm:$0xff]  ;;  %vm3343_vm11 = vcmask 31744   ;;  %s3860_s29 = smov 112   ;;  %s3861_s30 = smov 110  }
 0x237   :  { %v2342_v50 = vcombine.high %v5128_v32, %v5127_v24  ;;  %v2445_v58 = vrot.slane %v2437_v18, %v4186_v30  ;;  %v2453_v31 = vcombine.low %v2388_v29, %v4730_v40  ;;  %v2452_v4 = vrot.slane %v2438_v35, %v4186_v30 }
 0x238   :  { %v2871_v48 = vpop.permute.xlu0 %2870  ;;  %v2875_v34 = vpop.permute.xlu1 %2874  ;;  %v2339_v47 = vcombine.low %v2300_v45, %v2332_v8  ;;  %v2340_v9 = vcombine.high %v2300_v45, %v2332_v8  ;;  %v2413_v24 = vrot.slane %v2405_v28, %v4186_v30  ;;  %v2454_v57 = vcombine.high %v2388_v29, %v4730_v40 }
 0x239   :  { %v3318_v62 = vsel %vm3317_vm14, %v3316_v46, %v2871_v48  ;;  %v2406_v46 = vcombine.high %v2349_v11, %v4711_v10  ;;  %v2356_v32 = vrot.slane %v2342_v50, %v4052_v54  ;;  %vm3345_vm12 = vcmask 56320  }
 0x23a   :  { %3134 = vrot.lane.b32.xlu0 %v2334_v14, %s3832_s0  ;;  %3138 = vrot.lane.b32.xlu1 %v2335_v25, %s3833_s3  ;;  %v3320_v2 = vsel %vm3319_vm15, %v3318_v62, %v2875_v34  ;;  %v5129_v62 = vld [vmem:[#allocation72_spill] sm:$0xff]  ;;  %v2469_v25 = vcombine.low %v2413_v24, %v2445_v58  ;;  %v2470_v18 = vcombine.high %v2413_v24, %v2445_v58  ;;  %vm3347_vm13 = vcmask 80896   ;;  %s3862_s0 = smov 115   ;;  %s3863_s3 = smov 113  }
 0x23b   :  { %v2525_v59 = vcombine.low %v5129_v62, %v4526_v33  ;;  %v2421_v10 = vcombine.low %v2356_v32, %v4735_v13  ;;  %v2422_v45 = vcombine.high %v2356_v32, %v4735_v13  ;;  %v2526_v29 = vcombine.high %v5129_v62, %v4526_v33 }
 0x23c   :  { %v2879_v63 = vpop.permute.xlu0 %2878  ;;  %v2883_v22 = vpop.permute.xlu1 %2882  ;;  %v2468_v24 = vrot.slane %v2454_v57, %v4186_v30  ;;  %v2494_v32 = vcombine.high %v5131_v27, %v5130_v16  ;;  %vm3349_vm14 = vcmask 105472   ;;  %vm3351_vm15 = vcmask 130048  }
 0x23d   :  { %v3322_v41 = vsel %vm3321_vm0, %v3320_v2, %v2879_v63  ;;  %v2493_v2 = vcombine.low %v5131_v27, %v5130_v16  ;;  %v5132_v63 = vld [vmem:[#allocation82_spill] sm:$0xff]  ;;  %v4755_v28 = vrot.slane %v2525_v59, %v4052_v54  ;;  %v2436_v33 = vrot.slane %v2422_v45, %v4186_v30 }
 0x23e   :  { %3142 = vrot.lane.b32.xlu0 %v2336_v12, %s3834_s1  ;;  %3146 = vrot.lane.b32.xlu1 %v2337_v55, %s3835_s4  ;;  %v3324_v23 = vsel %vm3323_vm1, %v3322_v41, %v2883_v22  ;;  %v5133_v12 = vld [vmem:[#allocation63_spill] sm:$0xff]  ;;  %v2420_v41 = vrot.slane %v2406_v46, %v4186_v30  ;;  %v5134_v22 = vld [vmem:[#allocation40_spill] sm:$0xff]  ;;  %vm3353_vm0 = vcmask 154624   ;;  %vm3355_vm1 = vcmask 179200   ;;  %s3864_s1 = smov 118   ;;  %s3865_s4 = smov 116  }
 0x23f   :  { %v2509_v6 = vcombine.low %v5133_v12, %v5132_v63  ;;  %v5135_v55 = vld [vmem:[#allocation20_spill] sm:$0xff]  ;;  %v4760_v50 = vrot.slane %v2493_v2, %v4052_v54  ;;  %v2510_v62 = vcombine.high %v5133_v12, %v5132_v63  ;;  %v2508_v12 = vrot.slane %v2494_v32, %v4052_v54 }
 0x240   :  { %v2887_v39 = vpop.permute.xlu0 %2886  ;;  %v2891_v21 = vpop.permute.xlu1 %2890  ;;  %v2477_v8 = vcombine.low %v5135_v55, %v5134_v22  ;;  %v3511_v46 = vld [vmem:[#allocation2] sm:$0xff] }
 0x241   :  { %v3326_v7 = vsel %vm3325_vm2, %v3324_v23, %v2887_v39  ;;  %v2471_v39 = vcombine.low %v2420_v41, %v2452_v4  ;;  %v2517_v40 = vrot.slane %v2509_v6, %v4052_v54  ;;  %v2475_v6 = vcombine.low %v2436_v33, %v2468_v24 }
 0x242   :  { %3150 = vrot.lane.b32.xlu0 %v2338_v38, %s3836_s5  ;;  %3154 = vrot.lane.b32.xlu1 %v2339_v47, %s3837_s6  ;;  %v3328_v48 = vsel %vm3327_vm3, %v3326_v7, %v2891_v21  ;;  %v2461_v38 = vrot.slane %v2453_v31, %v4186_v30  ;;  %v2429_v7 = vrot.slane %v2421_v10, %v4186_v30  ;;  %vm3357_vm2 = vcmask 203776   ;;  %s3866_s5 = smov 121   ;;  %s3867_s6 = smov 119  }
 0x243   :  { %v2472_v47 = vcombine.high %v2420_v41, %v2452_v4  ;;  %v2485_v58 = vrot.slane %v2477_v8, %v4052_v54  ;;  %v2478_v4 = vcombine.high %v5135_v55, %v5134_v22  ;;  %v4779_v10 = vrot.slane %v2526_v29, %v4052_v54 }
 0x244   :  { %v2895_v14 = vpop.permute.xlu0 %2894  ;;  %v2899_v34 = vpop.permute.xlu1 %2898  ;;  %v2574_v27 = vcombine.high %v2517_v40, %v4755_v28  ;;  %v2524_v41 = vrot.slane %v2510_v62, %v4052_v54  ;;  %v2476_v55 = vcombine.high %v2436_v33, %v2468_v24  ;;  %vm3359_vm3 = vcmask 228352  }
 0x245   :  { %v3330_v5 = vsel %vm3329_vm4, %v3328_v48, %v2895_v14  ;;  %v2573_v48 = vcombine.low %v2517_v40, %v4755_v28  ;;  %v2541_v31 = vcombine.low %v2485_v58, %v4760_v50  ;;  %v2492_v8 = vrot.slane %v2478_v4, %v4052_v54  ;;  %v5142_v4 = vld [vmem:[#allocation19_spill] sm:$0xff] }
 0x246   :  { %3158 = vrot.lane.b32.xlu0 %v2340_v9, %s3838_s7  ;;  %3162 = vrot.lane.b32.xlu1 %v2469_v25, %s3839_s8  ;;  %v3332_v11 = vsel %vm3331_vm5, %v3330_v5, %v2899_v34  ;;  %v2473_v9 = vcombine.low %v2429_v7, %v2461_v38  ;;  %v2474_v25 = vcombine.high %v2429_v7, %v2461_v38  ;;  %vm3361_vm4 = vcmask 252928   ;;  %s3868_s7 = smov 124   ;;  %s3869_s8 = smov 122  }
 0x247   :  { %v2581_v63 = vrot.slane %v2573_v48, %v4186_v30  ;;  %v2549_v22 = vrot.slane %v2541_v31, %v4186_v30  ;;  %v2557_v45 = vcombine.low %v2492_v8, %v2508_v12  ;;  %v5137_v48 = vld [vmem:[#allocation51_spill] sm:$0xff]  ;;  %v2558_v24 = vcombine.high %v2492_v8, %v2508_v12  ;;  %v5139_v31 = vld [vmem:[#allocation81_spill] sm:$0xff] }
 0x248   :  { %v2903_v53 = vpop.permute.xlu0 %2902  ;;  %v2907_v23 = vpop.permute.xlu1 %2906  ;;  %vm3363_vm5 = vcmask 277504  }
 0x249   :  { %v3334_v52 = vsel %vm3333_vm6, %v3332_v11, %v2903_v53  ;;  %v2542_v11 = vcombine.high %v2485_v58, %v4760_v50  ;;  %v2606_v40 = vcombine.high %v2549_v22, %v2581_v63  ;;  %v2590_v58 = vcombine.high %v2524_v41, %v4779_v10 }
 0x24a   :  { %3166 = vrot.lane.b32.xlu0 %v2470_v18, %s3840_s9  ;;  %3170 = vrot.lane.b32.xlu1 %v2471_v39, %s3841_s10  ;;  %v3336_v35 = vsel %vm3335_vm7, %v3334_v52, %v2907_v23  ;;  %v2589_v52 = vcombine.low %v2524_v41, %v4779_v10  ;;  %v2605_v23 = vcombine.low %v2549_v22, %v2581_v63  ;;  %vm3365_vm6 = vcmask 302080   ;;  %s3870_s9 = smov 125   ;;  %s3871_s10 = smov [#allocation7]  }
 0x24b   :  { %v2588_v39 = vrot.slane %v2574_v27, %v4186_v30  ;;  %v2556_v7 = vrot.slane %v2542_v11, %v4186_v30  ;;  %v2604_v63 = vrot.slane %v2590_v58, %v4186_v30  ;;  %vm3367_vm7 = vcmask 326656  }
 0x24c   :  { %v2911_v21 = vpop.permute.xlu0 %2910  ;;  %v2915_v14 = vpop.permute.xlu1 %2914 }
 0x24d   :  { %v3338_v13 = vsel %vm3337_vm8, %v3336_v35, %v2911_v21  ;;  %v5136_v35 = vld [vmem:[#allocation71_spill] sm:$0xff]  ;;  %vm3369_vm8 = vcmask 351232  }
 0x24e   :  { %3174 = vrot.lane.b32.xlu0 %v2472_v47, %s3842_s11  ;;  %v3340_v5 = vsel %vm3339_vm9, %v3338_v13, %v2915_v14  ;;  %3178 = vrot.lane.b32.xlu1 %v2473_v9, %s3843_s12  ;;  %v2661_v21 = vcombine.low %v5136_v35, %v4521_v43  ;;  %v2597_v13 = vrot.slane %v2589_v52, %v4186_v30  ;;  %vm3371_vm9 = vcmask 375808   ;;  %s3526_s11 = sshll.u32 %s3871_s10, 4  ;;  %s3527_s11 = int_to_ptr.vmem [resolvable:$true] %s3526_s11 }
 0x24f   :  { %v3514_v59 = vmul.f32 %v3511_v46, %v3340_v5  ;;  %v2607_v46 = vcombine.low %v2556_v7, %v2588_v39  ;;  %v5140_v5 = vld [vmem:[#allocation62_spill] sm:$0xff]  ;;  %s3712_s12 = scalar_lea.vmem %s3527_s11, 384  ;;  %p3717_p3 = scmp.lt.s32.totalorder %s3527_s11, %s3527_s11 }
 0x250   :  { %v2919_v34 = vpop.permute.xlu0 %2918  ;;  %v2923_v2 = vpop.permute.xlu1 %2922  ;;  %v2645_v33 = vcombine.low %v5140_v5, %v5139_v31  ;;  %v4803_v27 = vrot.slane %v2661_v21, %v4052_v54  ;;  %p3713_p2 = scmp.ne.s32.totalorder %s3527_s11, %s3712_s12  ;;  %p3718_p4 = scmp.lt.s32.totalorder %s3712_s12, %s3712_s12 }
 0x251   :  { %v3342_v16 = vsel %vm3341_vm10, %v2915_v14, %v2919_v34  ;;  %3517 = vst [vmem:[#allocation7] sm:$0xff] %v3514_v59  ;;  %v5138_v14 = vld [vmem:[#allocation29_spill] sm:$0xff]  ;;  %v2565_v59 = vrot.slane %v2557_v45, %v4186_v30  ;;  %v2608_v34 = vcombine.high %v2556_v7, %v2588_v39  ;;  %vm3373_vm10 = vcmask 400384  }
 0x252   :  { %3182 = vrot.lane.b32.xlu0 %v2474_v25, %s3844_s13  ;;  %v3344_v53 = vsel %vm3343_vm11, %v3342_v16, %v2923_v2  ;;  %3186 = vrot.lane.b32.xlu1 %v2475_v6, %s3845_s14  ;;  %v2629_v9 = vcombine.low %v5138_v14, %v5137_v48  ;;  %v5141_v25 = vld [vmem:[#allocation39_spill] sm:$0xff]  ;;  %v4811_v41 = vrot.slane %v2645_v33, %v4052_v54  ;;  %vm3375_vm11 = vcmask 424960   ;;  %p3719_p5 = por %p3718_p4, %p3717_p3 }
 0x253   :  { %v2613_v10 = vcombine.low %v5142_v4, %v5141_v25  ;;  %v2609_v6 = vcombine.low %v2565_v59, %v2597_v13 }
 0x254   :  { %v2927_v18 = vpop.permute.xlu0 %2926  ;;  %v2931_v28 = vpop.permute.xlu1 %2930  ;;  %v4807_v12 = vrot.slane %v2629_v9, %v4052_v54  ;;  %p3720_p6 = pnand %p3719_p5, %p3713_p2 }
 0x255   :  { %v3346_v57 = vsel %vm3345_vm12, %v3344_v53, %v2927_v18  ;;  %v2572_v53 = vrot.slane %v2558_v24, %v4186_v30  ;;  %v1981_v18 = vcombine.low %v4126_v44, %v4340_v61  ;;  %v4816_v8 = vrot.slane %v2613_v10, %v4052_v54 }
 0x256   :  { %3190 = vrot.lane.b32.xlu0 %v2476_v55, %s3846_s15  ;;  %v3348_v38 = vsel %vm3347_vm13, %v3346_v57, %v2931_v28  ;;  %3194 = vrot.lane.b32.xlu1 %v2605_v23, %s3847_s16  ;;  %v2610_v55 = vcombine.high %v2565_v59, %v2597_v13  ;;  %v1949_v57 = vcombine.low %v3981_v42, %v4056_v15  ;;  %vm3377_vm12 = vcmask 449536  }
 0x257   :  { %v1965_v28 = vcombine.low %v5068_v0, %v4156_v56  ;;  %v2709_v23 = vcombine.low %v4811_v41, %v4803_v27  ;;  %v2611_v44 = vcombine.low %v2572_v53, %v2604_v63  ;;  %v1933_v61 = vcombine.low %v5070_v3, %v5069_v37 }
 0x258   :  { %v2935_v50 = vpop.permute.xlu0 %2934  ;;  %v2939_v29 = vpop.permute.xlu1 %2938  ;;  %v2677_v45 = vcombine.low %v4816_v8, %v4807_v12  ;;  %v4829_v42 = vrot.slane %v1981_v18, %v4052_v54  ;;  %v4832_v15 = vrot.slane %v1949_v57, %v4052_v54  ;;  %v2612_v37 = vcombine.high %v2572_v53, %v2604_v63 }
 0x259   :  { %v3350_v47 = vsel %vm3349_vm14, %v3348_v38, %v2935_v50  ;;  %v4835_v50 = vrot.slane %v1965_v28, %v4052_v54  ;;  %v2717_v3 = vrot.slane %v2709_v23, %v4186_v30  ;;  %v2630_v24 = vcombine.high %v5138_v14, %v5137_v48 }
 0x25a   :  { %3198 = vrot.lane.b32.xlu0 %v2606_v40, %s3848_s17  ;;  %v3352_v32 = vsel %vm3351_vm15, %v3350_v47, %v2939_v29  ;;  %3202 = vrot.lane.b32.xlu1 %v2607_v46, %s3849_s18  ;;  %v4842_v40 = vrot.slane %v1933_v61, %v4052_v54  ;;  %v2685_v29 = vrot.slane %v2677_v45, %v4186_v30  ;;  %vm3379_vm13 = vcmask 474112  }
 0x25b   :  { %v2029_v47 = vcombine.low %v4835_v50, %v4829_v42  ;;  %v2710_v46 = vcombine.high %v4811_v41, %v4803_v27  ;;  %v2030_v27 = vcombine.high %v4835_v50, %v4829_v42  ;;  %vm3381_vm14 = vcmask 498688  }
 0x25c   :  { %v2943_v62 = vpop.permute.xlu0 %2942  ;;  %v2947_v2 = vpop.permute.xlu1 %2946  ;;  %v1997_v51 = vcombine.low %v4842_v40, %v4832_v15  ;;  %v2741_v9 = vcombine.low %v2685_v29, %v2717_v3  ;;  %v2742_v10 = vcombine.high %v2685_v29, %v2717_v3  ;;  %vm3383_vm15 = vcmask 523264  }
 0x25d   :  { %v3354_v16 = vsel %vm3353_vm0, %v3352_v32, %v2943_v62  ;;  %v2678_v32 = vcombine.high %v4816_v8, %v4807_v12  ;;  %v2037_v62 = vrot.slane %v2029_v47, %v4186_v30  ;;  %vm3385_vm0 = vcmask 547840  }
 0x25e   :  { %3206 = vrot.lane.b32.xlu0 %v2608_v34, %s3850_s19  ;;  %v3356_v11 = vsel %vm3355_vm1, %v3354_v16, %v2947_v2  ;;  %3210 = vrot.lane.b32.xlu1 %v2609_v6, %s3851_s20  ;;  %v2005_v34 = vrot.slane %v1997_v51, %v4186_v30  ;;  %vm3387_vm1 = vcmask 572416  }
 0x260   :  { %v2951_v22 = vpop.permute.xlu0 %2950  ;;  %v2955_v39 = vpop.permute.xlu1 %2954  ;;  %v2061_v6 = vcombine.low %v2005_v34, %v2037_v62 }
 0x261   :  { %v3358_v52 = vsel %vm3357_vm2, %v3356_v11, %v2951_v22  ;;  %v2062_v22 = vcombine.high %v2005_v34, %v2037_v62  ;;  %vm3389_vm2 = vcmask 596992  }
 0x262   :  { %3214 = vrot.lane.b32.xlu0 %v2610_v55, %s3852_s21  ;;  %v3360_v38 = vsel %vm3359_vm3, %v3358_v52, %v2955_v39  ;;  %3218 = vrot.lane.b32.xlu1 %v2611_v44, %s3853_s22  ;;  %vm3391_vm3 = vcmask 621568  }
 0x264   :  { %v2959_v56 = vpop.permute.xlu0 %2958  ;;  %v2963_v7 = vpop.permute.xlu1 %2962 }
 0x265   :  { %v3362_v0 = vsel %vm3361_vm4, %v3360_v38, %v2959_v56  ;;  %vm3393_vm4 = vcmask 646144  }
 0x266   :  { %3054 = vrot.lane.b32.xlu0 %v1930_v26, %s3854_s23  ;;  %v3364_v21 = vsel %vm3363_vm5, %v3362_v0, %v2963_v7  ;;  %3222 = vrot.lane.b32.xlu1 %v2612_v37, %s3855_s24  ;;  %v2662_v26 = vcombine.high %v5136_v35, %v4521_v43  ;;  %v2646_v43 = vcombine.high %v5140_v5, %v5139_v31  ;;  %vm3395_vm5 = vcmask 670720  }
 0x267   :  { %v2724_v31 = vrot.slane %v2710_v46, %v4186_v30  ;;  %v4874_v5 = vrot.slane %v2630_v24, %v4052_v54  ;;  %v5143_v46 = vcombine.low %v4433_v1, %v4425_v60 }
 0x268   :  { %v2967_v58 = vpop.permute.xlu0 %2966  ;;  %v2971_v13 = vpop.permute.xlu1 %2970  ;;  %v4867_v48 = vrot.slane %v2662_v26, %v4052_v54  ;;  %v2660_v16 = vrot.slane %v2646_v43, %v4052_v54 }
 0x269   :  { %v3366_v17 = vsel %vm3365_vm6, %v3364_v21, %v2967_v58  ;;  %vm3397_vm6 = vcmask 695296  }
 0x26a   :  { %3058 = vrot.lane.b32.xlu0 %v1931_v19, %s3856_s25  ;;  %v3368_v33 = vsel %vm3367_vm7, %v3366_v17, %v2971_v13  ;;  %3226 = vrot.lane.b32.xlu1 %v2741_v9, %s3857_s26  ;;  %v2614_v19 = vcombine.high %v5142_v4, %v5141_v25  ;;  %v2692_v4 = vrot.slane %v2678_v32, %v4186_v30  ;;  %vm3399_vm7 = vcmask 719872  }
 0x26b   :  { %v2725_v63 = vcombine.low %v2660_v16, %v4867_v48  ;;  %v2726_v45 = vcombine.high %v2660_v16, %v4867_v48 }
 0x26c   :  { %v2975_v35 = vpop.permute.xlu0 %2974  ;;  %v2979_v14 = vpop.permute.xlu1 %2978  ;;  %v2628_v49 = vrot.slane %v2614_v19, %v4052_v54  ;;  %v2743_v11 = vcombine.low %v2692_v4, %v2724_v31  ;;  %v2044_v54 = vrot.slane %v2030_v27, %v4186_v30  ;;  %v2744_v57 = vcombine.high %v2692_v4, %v2724_v31 }
 0x26d   :  { %v3370_v59 = vsel %vm3369_vm8, %v3368_v33, %v2975_v35  ;;  %v2733_v52 = vrot.slane %v2725_v63, %v4186_v30  ;;  %v2740_v21 = vrot.slane %v2726_v45, %v4186_v30  ;;  %vm3401_vm8 = vcmask 744448  }
 0x26e   :  { %3062 = vrot.lane.b32.xlu0 %v1932_v20, %s3858_s27  ;;  %v3372_v25 = vsel %vm3371_vm9, %v3370_v59, %v2979_v14  ;;  %3230 = vrot.lane.b32.xlu1 %v2742_v10, %s3859_s28  ;;  %v1998_v20 = vcombine.high %v4842_v40, %v4832_v15  ;;  %v2693_v41 = vcombine.low %v2628_v49, %v4874_v5  ;;  %vm3403_vm9 = vcmask 769024  }
 0x26f   :  { %v2694_v0 = vcombine.high %v2628_v49, %v4874_v5 }
 0x270   :  { %v2983_v2 = vpop.permute.xlu0 %2982  ;;  %v2987_v12 = vpop.permute.xlu1 %2986  ;;  %v2012_v28 = vrot.slane %v1998_v20, %v4186_v30  ;;  %v2701_v44 = vrot.slane %v2693_v41, %v4186_v30 }
 0x271   :  { %v3374_v36 = vsel %vm3373_vm10, %v3372_v25, %v2983_v2  ;;  %v2708_v29 = vrot.slane %v2694_v0, %v4186_v30  ;;  %vm3405_vm10 = vcmask 793600  }
 0x272   :  { %3066 = vrot.lane.b32.xlu0 %v2061_v6, %s3860_s29  ;;  %v3376_v53 = vsel %vm3375_vm11, %v3374_v36, %v2987_v12  ;;  %3234 = vrot.lane.b32.xlu1 %v2743_v11, %s3861_s30  ;;  %v2063_v61 = vcombine.low %v2012_v28, %v2044_v54  ;;  %v2745_v56 = vcombine.low %v2701_v44, %v2733_v52  ;;  %vm3407_vm11 = vcmask 818176  }
 0x273   :  { %v2064_v7 = vcombine.high %v2012_v28, %v2044_v54  ;;  %v2746_v40 = vcombine.high %v2701_v44, %v2733_v52  ;;  %v2747_v26 = vcombine.low %v2708_v29, %v2740_v21  ;;  %v2748_v24 = vcombine.high %v2708_v29, %v2740_v21 }
 0x274   :  { %v2991_v18 = vpop.permute.xlu0 %2990  ;;  %v2995_v8 = vpop.permute.xlu1 %2994 }
 0x275   :  { %v3378_v55 = vsel %vm3377_vm12, %v3376_v53, %v2991_v18  ;;  %vm3427_vm12 = vcmask 15360  }
 0x276   :  { %3070 = vrot.lane.b32.xlu0 %v2062_v22, %s3862_s0  ;;  %v3380_v23 = vsel %vm3379_vm13, %v3378_v55, %v2995_v8  ;;  %3238 = vrot.lane.b32.xlu1 %v2744_v57, %s3863_s3  ;;  %vm3429_vm13 = vcmask 39936  }
 0x278   :  { %v2999_v39 = vpop.permute.xlu0 %2998  ;;  %v3003_v42 = vpop.permute.xlu1 %3002 }
 0x279   :  { %v3382_v38 = vsel %vm3381_vm14, %v3380_v23, %v2999_v39  ;;  %vm3431_vm14 = vcmask 64512  }
 0x27a   :  { %3074 = vrot.lane.b32.xlu0 %v2063_v61, %s3864_s1  ;;  %v3384_v15 = vsel %vm3383_vm15, %v3382_v38, %v3003_v42  ;;  %3242 = vrot.lane.b32.xlu1 %v2745_v56, %s3865_s4  ;;  %vm3433_vm15 = vcmask 89088  }
 0x27c   :  { %v3007_v50 = vpop.permute.xlu0 %3006  ;;  %v3011_v3 = vpop.permute.xlu1 %3010 }
 0x27d   :  { %v3386_v37 = vsel %vm3385_vm0, %v3384_v15, %v3007_v50  ;;  %vm3435_vm0 = vcmask 113664  }
 0x27e   :  { %3078 = vrot.lane.b32.xlu0 %v2064_v7, %s3866_s5  ;;  %v3388_v47 = vsel %vm3387_vm1, %v3386_v37, %v3011_v3  ;;  %3246 = vrot.lane.b32.xlu1 %v2746_v40, %s3867_s6  ;;  %vm3437_vm1 = vcmask 138240  }
 0x280   :  { %v3015_v58 = vpop.permute.xlu0 %3014  ;;  %v3019_v17 = vpop.permute.xlu1 %3018 }
 0x281   :  { %v3390_v51 = vsel %vm3389_vm2, %v3388_v47, %v3015_v58  ;;  %vm3439_vm2 = vcmask 162816  }
 0x282   :  { %3082 = vrot.lane.b32.xlu0 %v5143_v46, %s3868_s7  ;;  %v3392_v13 = vsel %vm3391_vm3, %v3390_v51, %v3019_v17  ;;  %3250 = vrot.lane.b32.xlu1 %v2747_v26, %s3869_s8  ;;  %vm3441_vm3 = vcmask 187392  }
 0x284   :  { %v3023_v9 = vpop.permute.xlu0 %3022  ;;  %v3027_v33 = vpop.permute.xlu1 %3026 }
 0x285   :  { %v3394_v32 = vsel %vm3393_vm4, %v3392_v13, %v3023_v9  ;;  %vm3443_vm4 = vcmask 211968  }
 0x286   :  { %3254 = vrot.lane.b32.xlu0 %v2748_v24, %s3870_s9  ;;  %v3396_v30 = vsel %vm3395_vm5, %v3394_v32, %v3027_v33  ;;  %vm3445_vm5 = vcmask 236544  }
 0x288   :  { %v3031_v43 = vpop.permute.xlu0 %3030  ;;  %v3035_v62 = vpop.permute.xlu1 %3034 }
 0x289   :  { %v3398_v35 = vsel %vm3397_vm6, %v3396_v30, %v3031_v43  ;;  %vm3447_vm6 = vcmask 261120  }
 0x28a   :  { %v3400_v60 = vsel %vm3399_vm7, %v3398_v35, %v3035_v62  ;;  %vm3449_vm7 = vcmask 285696  }
 0x28c   :  { %v3039_v1 = vpop.permute.xlu0 %3038  ;;  %v3043_v59 = vpop.permute.xlu1 %3042 }
 0x28d   :  { %v3402_v19 = vsel %vm3401_vm8, %v3400_v60, %v3039_v1  ;;  %vm3451_vm8 = vcmask 310272  }
 0x28e   :  { %v3404_v34 = vsel %vm3403_vm9, %v3402_v19, %v3043_v59  ;;  %vm3453_vm9 = vcmask 334848  }
 0x290   :  { %v3047_v48 = vpop.permute.xlu0 %3046  ;;  %v3051_v10 = vpop.permute.xlu1 %3050 }
 0x291   :  { %v3406_v14 = vsel %vm3405_vm10, %v3404_v34, %v3047_v48  ;;  %vm3455_vm10 = vcmask 359424  }
 0x292   :  { %v4896_v31 = vsel %vm3407_vm11, %v3406_v14, %v3051_v10  ;;  %vm3457_vm11 = vcmask 384000  }
 0x294   :  { %v4898_v5 = vpop.permute.xlu0 %3086  ;;  %v3091_v25 = vpop.permute.xlu1 %3090 }
 0x295   :  { %v3428_v41 = vsel %vm3427_vm12, %v4898_v5, %v3091_v25  ;;  %vm3459_vm12 = vcmask 408576  }
 0x298   :  { %v3095_v4 = vpop.permute.xlu0 %3094  ;;  %v3099_v16 = vpop.permute.xlu1 %3098 }
 0x299   :  { %v3430_v22 = vsel %vm3429_vm13, %v3428_v41, %v3095_v4  ;;  %vm3461_vm13 = vcmask 433152  }
 0x29a   :  { %v3432_v55 = vsel %vm3431_vm14, %v3430_v22, %v3099_v16  ;;  %vm3463_vm14 = vcmask 457728  }
 0x29c   :  { %v3103_v27 = vpop.permute.xlu0 %3102  ;;  %v3107_v2 = vpop.permute.xlu1 %3106 }
 0x29d   :  { %v3434_v57 = vsel %vm3433_vm15, %v3432_v55, %v3103_v27  ;;  %vm3465_vm15 = vcmask 482304  }
 0x29e   :  { %v3436_v28 = vsel %vm3435_vm0, %v3434_v57, %v3107_v2  ;;  %vm3467_vm0 = vcmask 506880  }
 0x2a0   :  { %v3111_v6 = vpop.permute.xlu0 %3110  ;;  %v3115_v49 = vpop.permute.xlu1 %3114 }
 0x2a1   :  { %v3438_v39 = vsel %vm3437_vm1, %v3436_v28, %v3111_v6  ;;  %vm3469_vm1 = vcmask 531456  }
 0x2a2   :  { %v3440_v61 = vsel %vm3439_vm2, %v3438_v39, %v3115_v49  ;;  %vm3471_vm2 = vcmask 556032  }
 0x2a4   :  { %v3119_v36 = vpop.permute.xlu0 %3118  ;;  %v3123_v20 = vpop.permute.xlu1 %3122 }
 0x2a5   :  { %v3442_v45 = vsel %vm3441_vm3, %v3440_v61, %v3119_v36  ;;  %vm3473_vm3 = vcmask 580608  }
 0x2a6   :  { %v3444_v56 = vsel %vm3443_vm4, %v3442_v45, %v3123_v20  ;;  %vm3475_vm4 = vcmask 605184  }
 0x2a8   :  { %v3127_v63 = vpop.permute.xlu0 %3126  ;;  %v3131_v12 = vpop.permute.xlu1 %3130 }
 0x2a9   :  { %v3446_v0 = vsel %vm3445_vm5, %v3444_v56, %v3127_v63  ;;  %vm3477_vm5 = vcmask 629760  }
 0x2aa   :  { %v3448_v7 = vsel %vm3447_vm6, %v3446_v0, %v3131_v12  ;;  %vm3479_vm6 = vcmask 654336  }
 0x2ac   :  { %v3135_v11 = vpop.permute.xlu0 %3134  ;;  %v3139_v53 = vpop.permute.xlu1 %3138 }
 0x2ad   :  { %v3450_v3 = vsel %vm3449_vm7, %v3448_v7, %v3135_v11  ;;  %vm3481_vm7 = vcmask 678912  }
 0x2ae   :  { %v3452_v21 = vsel %vm3451_vm8, %v3450_v3, %v3139_v53  ;;  %vm3483_vm8 = vcmask 703488  }
 0x2b0   :  { %v3143_v18 = vpop.permute.xlu0 %3142  ;;  %v3147_v54 = vpop.permute.xlu1 %3146 }
 0x2b1   :  { %v3454_v58 = vsel %vm3453_vm9, %v3452_v21, %v3143_v18  ;;  %vm3485_vm9 = vcmask 728064   ;;  %v3513_v21 = vld [vmem:[#allocation2 + $0x10] sm:$0xff] }
 0x2b2   :  { %v3456_v51 = vsel %vm3455_vm10, %v3454_v58, %v3147_v54  ;;  %vm3487_vm10 = vcmask 752640  }
 0x2b4   :  { %v3151_v8 = vpop.permute.xlu0 %3150  ;;  %v3155_v52 = vpop.permute.xlu1 %3154 }
 0x2b5   :  { %v3458_v26 = vsel %vm3457_vm11, %v3456_v51, %v3151_v8  ;;  %vm3489_vm11 = vcmask 777216  }
 0x2b6   :  { %v3460_v13 = vsel %vm3459_vm12, %v3458_v26, %v3155_v52  ;;  %vm3409_vm12 = vcmask 842752  }
 0x2b8   :  { %v3159_v23 = vpop.permute.xlu0 %3158  ;;  %v3163_v44 = vpop.permute.xlu1 %3162 }
 0x2b9   :  { %v3462_v24 = vsel %vm3461_vm13, %v3460_v13, %v3159_v23  ;;  %vm3411_vm13 = vcmask 867328  }
 0x2ba   :  { %v3464_v33 = vsel %vm3463_vm14, %v3462_v24, %v3163_v44  ;;  %vm3491_vm14 = vcmask 801792  }
 0x2bc   :  { %v3167_v38 = vpop.permute.xlu0 %3166  ;;  %v3171_v42 = vpop.permute.xlu1 %3170 }
 0x2bd   :  { %v3466_v43 = vsel %vm3465_vm15, %v3464_v33, %v3167_v38  ;;  %vm3413_vm15 = vcmask 891904  }
 0x2be   :  { %v3468_v62 = vsel %vm3467_vm0, %v3466_v43, %v3171_v42  ;;  %vm3493_vm0 = vcmask 826368   ;;  %v3512_v42 = vld [vmem:[#allocation2 + $0x8] sm:$0xff] }
 0x2c0   :  { %v3175_v15 = vpop.permute.xlu0 %3174  ;;  %v3179_v50 = vpop.permute.xlu1 %3178 }
 0x2c1   :  { %v3470_v1 = vsel %vm3469_vm1, %v3468_v62, %v3175_v15  ;;  %vm3415_vm1 = vcmask 916480  }
 0x2c2   :  { %v3472_v59 = vsel %vm3471_vm2, %v3470_v1, %v3179_v50  ;;  %vm3495_vm2 = vcmask 850944  }
 0x2c4   :  { %v3183_v37 = vpop.permute.xlu0 %3182  ;;  %v3187_v40 = vpop.permute.xlu1 %3186 }
 0x2c5   :  { %v3474_v48 = vsel %vm3473_vm3, %v3472_v59, %v3183_v37  ;;  %vm3417_vm3 = vcmask 941056  }
 0x2c6   :  { %v3476_v10 = vsel %vm3475_vm4, %v3474_v48, %v3187_v40  ;;  %vm3497_vm4 = vcmask 875520  }
 0x2c8   :  { %v3191_v47 = vpop.permute.xlu0 %3190  ;;  %v3195_v29 = vpop.permute.xlu1 %3194 }
 0x2c9   :  { %v3478_v4 = vsel %vm3477_vm5, %v3476_v10, %v3191_v47  ;;  %vm3419_vm5 = vcmask 965632  }
 0x2ca   :  { %v3480_v27 = vsel %vm3479_vm6, %v3478_v4, %v3195_v29  ;;  %vm3499_vm6 = vcmask 900096  }
 0x2cc   :  { %v3199_v17 = vpop.permute.xlu0 %3198  ;;  %v3203_v46 = vpop.permute.xlu1 %3202 }
 0x2cd   :  { %v3482_v6 = vsel %vm3481_vm7, %v3480_v27, %v3199_v17  ;;  %vm3421_vm7 = vcmask 990208  }
 0x2ce   :  { %v3484_v36 = vsel %vm3483_vm8, %v3482_v6, %v3203_v46  ;;  %vm3501_vm8 = vcmask 924672  }
 0x2d0   :  { %v3207_v9 = vpop.permute.xlu0 %3206  ;;  %v3211_v32 = vpop.permute.xlu1 %3210 }
 0x2d1   :  { %v3486_v63 = vsel %vm3485_vm9, %v3484_v36, %v3207_v9  ;;  %vm3423_vm9 = vcmask 1014784  }
 0x2d2   :  { %v3488_v11 = vsel %vm3487_vm10, %v3486_v63, %v3211_v32  ;;  %vm3503_vm10 = vcmask 949248  }
 0x2d4   :  { %v3215_v30 = vpop.permute.xlu0 %3214  ;;  %v3219_v35 = vpop.permute.xlu1 %3218 }
 0x2d5   :  { %v3490_v41 = vsel %vm3489_vm11, %v3488_v11, %v3215_v30  ;;  %vm3425_vm11 = vcmask 1039360  }
 0x2d6   :  { %v3492_v55 = vsel %vm3491_vm14, %v3490_v41, %v3219_v35  ;;  %vm3509_vm14 = vcmask 1022976  }
 0x2d8   :  { %v3055_v60 = vpop.permute.xlu0 %3054  ;;  %v3223_v19 = vpop.permute.xlu1 %3222 }
 0x2d9   :  { %v3410_v18 = vsel %vm3409_vm12, %v4896_v31, %v3055_v60  ;;  %v3494_v52 = vsel %vm3493_vm0, %v3492_v55, %v3223_v19  ;;  %vm3505_vm12 = vcmask 973824  }
 0x2dc   :  { %v3059_v34 = vpop.permute.xlu0 %3058  ;;  %v3227_v14 = vpop.permute.xlu1 %3226 }
 0x2dd   :  { %v3412_v54 = vsel %vm3411_vm13, %v3410_v18, %v3059_v34  ;;  %v3496_v23 = vsel %vm3495_vm2, %v3494_v52, %v3227_v14  ;;  %vm3507_vm13 = vcmask 998400  }
 0x2e0   :  { %v3063_v25 = vpop.permute.xlu0 %3062  ;;  %v3231_v16 = vpop.permute.xlu1 %3230 }
 0x2e1   :  { %v3414_v8 = vsel %vm3413_vm15, %v3412_v54, %v3063_v25  ;;  %v3498_v31 = vsel %vm3497_vm4, %v3496_v23, %v3231_v16 }
 0x2e4   :  { %v3067_v2 = vpop.permute.xlu0 %3066  ;;  %v3235_v49 = vpop.permute.xlu1 %3234 }
 0x2e5   :  { %v3416_v28 = vsel %vm3415_vm1, %v3414_v8, %v3067_v2  ;;  %v3500_v38 = vsel %vm3499_vm6, %v3498_v31, %v3235_v49 }
 0x2e8   :  { %v3071_v20 = vpop.permute.xlu0 %3070  ;;  %v3239_v12 = vpop.permute.xlu1 %3238 }
 0x2e9   :  { %v3418_v39 = vsel %vm3417_vm3, %v3416_v28, %v3071_v20  ;;  %v3502_v15 = vsel %vm3501_vm8, %v3500_v38, %v3239_v12 }
 0x2ec   :  { %v3075_v53 = vpop.permute.xlu0 %3074  ;;  %v3243_v22 = vpop.permute.xlu1 %3242 }
 0x2ed   :  { %v3420_v61 = vsel %vm3419_vm5, %v3418_v39, %v3075_v53  ;;  %v3504_v50 = vsel %vm3503_vm10, %v3502_v15, %v3243_v22 }
 0x2f0   :  { %v3079_v57 = vpop.permute.xlu0 %3078  ;;  %v3247_v44 = vpop.permute.xlu1 %3246 }
 0x2f1   :  { %v3422_v45 = vsel %vm3421_vm7, %v3420_v61, %v3079_v57  ;;  %v3506_v3 = vsel %vm3505_vm12, %v3504_v50, %v3247_v44 }
 0x2f4   :  { %v3083_v56 = vpop.permute.xlu0 %3082  ;;  %v3251_v7 = vpop.permute.xlu1 %3250 }
 0x2f5   :  { %v3424_v0 = vsel %vm3423_vm9, %v3422_v45, %v3083_v56  ;;  %v3508_v47 = vsel %vm3507_vm13, %v3506_v3, %v3251_v7 }
 0x2f6   :  { %v3426_v37 = vsel %vm3425_vm11, %v3424_v0, %v4898_v5 }
 0x2f7   :  { %v3515_v40 = vmul.f32 %v3512_v42, %v3426_v37 }
 0x2f8   :  { %v3255_v58 = vpop.permute.xlu0 %3254 }
 0x2f9   :  { %3518 = vst [vmem:[#allocation7 + $0x8] sm:$0xff] %v3515_v40  ;;  %v3510_v29 = vsel %vm3509_vm14, %v3508_v47, %v3255_v58 }
 0x2fa   :  { %v3516_v51 = vmul.f32 %v3513_v21, %v3510_v29 }
 0x2fc   :  { %3519 = vst [vmem:[#allocation7 + $0x10] sm:$0xff] %v3516_v51 }
 0x2fd   :  { %3723 = shalt.err (!%p3720_p6)
}
 0x2fe   :  { %s3724_s15 = scalar_lea.hbm %s4917_s2, 384 }
 0x2ff   :  { %p3725_p7 = scmp.ne.s32.totalorder %s4917_s2, %s3724_s15  ;;  %p3728_p8 = scmp.lt.u32.totalorder %s3724_s15, %s4917_s2 }
 0x301   :  { %p3730_p9 = pnand %p3728_p8, %p3725_p7 }
 0x303   :  { %3733 = shalt.err (!%p3730_p9)
}
 0x304   :  { %3529 = dma.vmem_to_hbm [thread:$0]  %s3527_s11, 384, %s4917_s2, [#allocation4]  }
 0x305   :  { %3738 = dma.done.wait [#allocation4], 384  }
 0x306   :  { %3739 = vsyncadd [#allocation4], 4294966912 }
 0x307   :  { %3533 = vsyncpa [#allocation3], 1 }
 0x308   :  { %3534 = vsyncpa [#allocation6], 1 }
 0x309   :  { %3535 = vsyncpa [#allocation4], 1 }

</bundles_post_ra>
